<compile_context>
chip_gen: v6e
topology: v6e:2x2x1
jax: 0.10.0
libtpu: 0.0.40
codegen_flags: <defaults>
</compile_context>

<pallas_src>
import jax
import jax.numpy as jnp
from jax import lax
from jax.experimental import pallas as pl
from jax.experimental.pallas import tpu as pltpu  # noqa: F401  (TPU backend)

# ---- hp.embedder.* (small, TPU-friendly sizes) -------------------------------
NUM_MELS = 32      # hp.embedder.num_mels
LSTM_HIDDEN = 32   # hp.embedder.lstm_hidden
LSTM_LAYERS = 2    # hp.embedder.lstm_layers
EMB_DIM = 32       # hp.embedder.emb_dim
WINDOW = 8         # hp.embedder.window
STRIDE = 4         # hp.embedder.stride
T_FRAMES = 40      # mel time axis length -> F = (40-8)//4 + 1 = 9 windows


# ---------------------------- Pallas kernel ----------------------------------
def _make_kernel(W, F, Fp, H):
    """Kernel closure over static sizes: W timesteps, F valid windows,
    Fp (sublane-padded) window rows, H hidden size."""

    def kernel(x_ref,        # (W*Fp, M)  bf16  time-major flattened windows
               wih0_ref,     # (M, 4H)    bf16
               whh0_ref,     # (H, 4H)    bf16
               b0_ref,       # (1, 4H)    f32   (b_ih0 + b_hh0)
               w1_ref,       # (2H, 4H)   bf16  [W_ih1 ; W_hh1] stacked
               b1_ref,       # (1, 4H)    f32   (b_ih1 + b_hh1)
               wp_ref,       # (H, E)     bf16
               bp_ref,       # (1, E)     f32
               out_ref):     # (1, E)     f32
        f32, bf16 = jnp.float32, jnp.bfloat16

        # Hoisted layer-0 input projection for all W timesteps at once
        # (off the serial recurrence): (W*Fp, M) @ (M, 4H) + b0.
        xg = jnp.dot(x_ref[...], wih0_ref[...],
                     preferred_element_type=f32) + b0_ref[...]       # (W*Fp, 4H)

        whh0 = whh0_ref[...]          # (H, 4H)  bf16
        w1 = w1_ref[...]              # (2H, 4H) bf16
        b1 = b1_ref[...]              # (1, 4H)  f32

        def cell_tail(gates, c):
            # Full-width nonlinearities (2 EUP passes over all 4H lanes),
            # then 32-lane gate slices. Gate order: i, f, g, o (torch LSTM).
            sg = jax.nn.sigmoid(gates)
            tg = jnp.tanh(gates)
            i = sg[:, 0 * H:1 * H]
            f = sg[:, 1 * H:2 * H]
            g = tg[:, 2 * H:3 * H]
            o = sg[:, 3 * H:4 * H]
            c_new = f * c + i * g
            h_new = o * jnp.tanh(c_new)
            return h_new, c_new

        z = jnp.zeros((Fp, H), f32)
        h0, c0, h1, c1 = z, z, z, z

        for t in range(W):            # fully unrolled (W == 8), static slices
            # layer 0: input gates precomputed; only the recurrent matmul here
            g0 = xg[t * Fp:(t + 1) * Fp, :] + jnp.dot(
                h0.astype(bf16), whh0, preferred_element_type=f32)
            h0, c0 = cell_tail(g0, c0)
            # layer 1: fused x/h matmul via lane-concat of [h0_new, h1]
            xh = jnp.concatenate([h0, h1], axis=1).astype(bf16)      # (Fp, 2H)
            g1 = jnp.dot(xh, w1, preferred_element_type=f32) + b1
            h1, c1 = cell_tail(g1, c1)

        # projection -> per-window L2 norm -> mean over the F valid windows
        y = jnp.dot(h1.astype(bf16), wp_ref[...],
                    preferred_element_type=f32) + bp_ref[...]        # (Fp, E)
        ss = jnp.sum(y * y, axis=1, keepdims=True)                   # (Fp, 1)
        row = lax.broadcasted_iota(jnp.int32, (Fp, 1), 0)
        # No epsilon in the norm, matching torch.norm in the reference module;
        # padded rows are masked to zero before the mean.
        inv = jnp.where(row < F, lax.rsqrt(ss), 0.0)
        y = y * inv
        out_ref[...] = (jnp.sum(y, axis=0, keepdims=True) *
                        (1.0 / F)).astype(out_ref.dtype)

    return kernel


# ------------------------------ wrapper ---------------------------------------
def speech_embedder(mel, params):
    # mel: (num_mels, T)   (matches torch: mel.unfold(1, window, stride))
    M, T = mel.shape
    W, H, E = WINDOW, LSTM_HIDDEN, EMB_DIM
    F = (T - W) // STRIDE + 1
    Fp = ((F + 7) // 8) * 8           # pad window count to sublane multiple

    # torch: mel.unfold(1, window, stride).permute(1, 2, 0) -> (F, W, M);
    # kernel consumes time-major rows flattened to (W*Fp, M).
    idx = jnp.arange(F)[:, None] * STRIDE + jnp.arange(W)[None, :]   # (F, W)
    mels = jnp.transpose(mel[:, idx], (2, 1, 0))                     # (W, F, M)
    mels = jnp.pad(mels, ((0, 0), (0, Fp - F), (0, 0)))              # (W, Fp, M)
    x_flat = mels.reshape(W * Fp, M).astype(jnp.bfloat16)

    wih0, whh0, b0, wih1, whh1, b1, wp, bp = params
    bf16 = jnp.bfloat16
    w1 = jnp.concatenate([wih1, whh1], axis=0).astype(bf16)          # (2H, 4H)
    args = (x_flat, wih0.astype(bf16), whh0.astype(bf16), b0,
            w1, b1, wp.astype(bf16), bp)

    def full_spec(a):
        nd = a.ndim
        return pl.BlockSpec(a.shape, lambda i, _nd=nd: (0,) * _nd)

    out = pl.pallas_call(
        _make_kernel(W, F, Fp, H),
        out_shape=jax.ShapeDtypeStruct((1, E), jnp.float32),
        grid=(1,),
        in_specs=[full_spec(a) for a in args],
        out_specs=pl.BlockSpec((1, E), lambda i: (0, 0)),
    )(*args)
    return out[0]


# ----------------------- deterministic parameter init -------------------------
def init_params(key):
    keys = jax.random.split(key, 10)
    k = 1.0 / float(jnp.sqrt(LSTM_HIDDEN))

    def u(kk, shape):
        return jax.random.uniform(kk, shape, jnp.float32, -k, k)

    # LSTM layer 0 (input = num_mels), layer 1 (input = hidden); weights stored
    # transposed as (in, 4H); biases are b_ih + b_hh, shape (1, 4H).
    wih0 = u(keys[0], (NUM_MELS, 4 * LSTM_HIDDEN))
    whh0 = u(keys[1], (LSTM_HIDDEN, 4 * LSTM_HIDDEN))
    b0 = u(keys[2], (1, 4 * LSTM_HIDDEN)) + u(keys[3], (1, 4 * LSTM_HIDDEN))
    wih1 = u(keys[4], (LSTM_HIDDEN, 4 * LSTM_HIDDEN))
    whh1 = u(keys[5], (LSTM_HIDDEN, 4 * LSTM_HIDDEN))
    b1 = u(keys[6], (1, 4 * LSTM_HIDDEN)) + u(keys[7], (1, 4 * LSTM_HIDDEN))
    # Linear projection (emb_dim x lstm_hidden) stored transposed as (H, E).
    wp = u(keys[8], (LSTM_HIDDEN, EMB_DIM))
    bp = u(keys[9], (1, EMB_DIM))
    return (wih0, whh0, b0, wih1, whh1, b1, wp, bp)


# --------------------------- pure-JAX references --------------------------------
def reference(mel, params, matmul_bf16=True):
    """matmul_bf16=True mirrors the kernel's precision recipe (bf16 operands,
    f32 accumulate); matmul_bf16=False is an exact-f32 semantic reference."""
    wih0, whh0, b0, wih1, whh1, b1, wp, bp = params
    M, T = mel.shape
    F = (T - WINDOW) // STRIDE + 1
    idx = jnp.arange(F)[:, None] * STRIDE + jnp.arange(WINDOW)[None, :]
    mels = jnp.transpose(mel[:, idx], (2, 1, 0))    # (W, F, M)
    H = LSTM_HIDDEN

    if matmul_bf16:
        def dot(a, b):
            return jnp.dot(a.astype(jnp.bfloat16), b.astype(jnp.bfloat16),
                           preferred_element_type=jnp.float32)
    else:
        def dot(a, b):
            return jnp.dot(a, b, precision=lax.Precision.HIGHEST)

    def cell(x, h, c, wih, whh, b):
        g = dot(x, wih) + dot(h, whh) + b
        i = jax.nn.sigmoid(g[:, :H])
        f = jax.nn.sigmoid(g[:, H:2 * H])
        gg = jnp.tanh(g[:, 2 * H:3 * H])
        o = jax.nn.sigmoid(g[:, 3 * H:])
        c = f * c + i * gg
        return o * jnp.tanh(c), c

    z = jnp.zeros((F, H), jnp.float32)
    h0 = c0 = h1 = c1 = z
    for t in range(WINDOW):
        h0, c0 = cell(mels[t], h0, c0, wih0, whh0, b0)
        h1, c1 = cell(h0, h1, c1, wih1, whh1, b1)
    y = dot(h1, wp) + bp
    y = y / jnp.sqrt(jnp.sum(y * y, axis=1, keepdims=True))
    return jnp.sum(y, axis=0) / F


if __name__ == "__main__":
    key = jax.random.PRNGKey(0)
    k_mel, k_params = jax.random.split(key)
    mel = jax.random.normal(k_mel, (NUM_MELS, T_FRAMES), jnp.float32)
    params = init_params(k_params)

    emb = jax.block_until_ready(speech_embedder(mel, params))

    ref_matched = jax.block_until_ready(reference(mel, params, matmul_bf16=True))
    ref_f32 = jax.block_until_ready(reference(mel, params, matmul_bf16=False))

    assert emb.shape == (EMB_DIM,), emb.shape
    assert bool(jnp.all(jnp.isfinite(emb)))
    # tight check against a precision-matched reference
    assert jnp.allclose(emb, ref_matched, atol=2e-3, rtol=2e-3), (emb, ref_matched)
    # loose semantic check against exact-f32 reference (bf16 MXU rounding only)
    assert jnp.allclose(emb, ref_f32, atol=2e-2, rtol=2e-2), (emb, ref_f32)

    print("KERNEL_OK")
</pallas_src>

<mosaic_0001>
module attributes {stable_mosaic.version = 11 : i64} {
  func.func @kernel(%arg0: i32, %arg1: memref<128x32xbf16, #tpu.memory_space<vmem>>, %arg2: memref<32x128xbf16, #tpu.memory_space<vmem>>, %arg3: memref<32x128xbf16, #tpu.memory_space<vmem>>, %arg4: memref<1x128xf32, #tpu.memory_space<vmem>>, %arg5: memref<64x128xbf16, #tpu.memory_space<vmem>>, %arg6: memref<1x128xf32, #tpu.memory_space<vmem>>, %arg7: memref<32x32xbf16, #tpu.memory_space<vmem>>, %arg8: memref<1x32xf32, #tpu.memory_space<vmem>>, %arg9: memref<1x32xf32, #tpu.memory_space<vmem>>) attributes {dimension_semantics = [#tpu.dimension_semantics<arbitrary>], iteration_bounds = array<i64: 1>, scalar_prefetch = 0 : i64, scratch_operands = 0 : i64, tpu.core_type = #tpu.core_type<tc>, window_params = [{pipeline_mode = #tpu.pipeline_mode<synchronous>, transform_indices = @transform_0, window_bounds = array<i64: 128, 32>}, {pipeline_mode = #tpu.pipeline_mode<synchronous>, transform_indices = @transform_1, window_bounds = array<i64: 32, 128>}, {pipeline_mode = #tpu.pipeline_mode<synchronous>, transform_indices = @transform_2, window_bounds = array<i64: 32, 128>}, {pipeline_mode = #tpu.pipeline_mode<synchronous>, transform_indices = @transform_3, window_bounds = array<i64: 1, 128>}, {pipeline_mode = #tpu.pipeline_mode<synchronous>, transform_indices = @transform_4, window_bounds = array<i64: 64, 128>}, {pipeline_mode = #tpu.pipeline_mode<synchronous>, transform_indices = @transform_5, window_bounds = array<i64: 1, 128>}, {pipeline_mode = #tpu.pipeline_mode<synchronous>, transform_indices = @transform_6, window_bounds = array<i64: 32, 32>}, {pipeline_mode = #tpu.pipeline_mode<synchronous>, transform_indices = @transform_7, window_bounds = array<i64: 1, 32>}, {pipeline_mode = #tpu.pipeline_mode<synchronous>, transform_indices = @transform_8, window_bounds = array<i64: 1, 32>}]} {
    %c0 = arith.constant 0 : index
    %c0_0 = arith.constant 0 : index
    %0 = vector.load %arg1[%c0, %c0_0] : memref<128x32xbf16, #tpu.memory_space<vmem>>, vector<128x32xbf16>
    %c0_1 = arith.constant 0 : index
    %c0_2 = arith.constant 0 : index
    %1 = vector.load %arg2[%c0_1, %c0_2] : memref<32x128xbf16, #tpu.memory_space<vmem>>, vector<32x128xbf16>
    %cst = arith.constant dense<0.000000e+00> : vector<128x128xf32>
    %2 = tpu.matmul %0, %1, %cst {dimension_numbers = #tpu.dot_dimension_numbers<[1], [0], [0], [1], [0, 0, 1, 1], [], []>} : vector<128x32xbf16>, vector<32x128xbf16>, vector<128x128xf32> -> vector<128x128xf32>
    %c0_3 = arith.constant 0 : index
    %c0_4 = arith.constant 0 : index
    %3 = vector.load %arg4[%c0_3, %c0_4] : memref<1x128xf32, #tpu.memory_space<vmem>>, vector<1x128xf32>
    %4 = vector.broadcast %3 : vector<1x128xf32> to vector<128x128xf32>
    %5 = arith.addf %2, %4 : vector<128x128xf32>
    %c0_5 = arith.constant 0 : index
    %c0_6 = arith.constant 0 : index
    %6 = vector.load %arg3[%c0_5, %c0_6] : memref<32x128xbf16, #tpu.memory_space<vmem>>, vector<32x128xbf16>
    %c0_7 = arith.constant 0 : index
    %c0_8 = arith.constant 0 : index
    %7 = vector.load %arg5[%c0_7, %c0_8] : memref<64x128xbf16, #tpu.memory_space<vmem>>, vector<64x128xbf16>
    %c0_9 = arith.constant 0 : index
    %c0_10 = arith.constant 0 : index
    %8 = vector.load %arg6[%c0_9, %c0_10] : memref<1x128xf32, #tpu.memory_space<vmem>>, vector<1x128xf32>
    %cst_11 = arith.constant 0.000000e+00 : f32
    %9 = vector.broadcast %cst_11 : f32 to vector<16x32xf32>
    %10 = vector.extract_strided_slice %5 {offsets = [0, 0], sizes = [16, 128], strides = [1, 1]} : vector<128x128xf32> to vector<16x128xf32>
    %11 = arith.truncf %9 : vector<16x32xf32> to vector<16x32xbf16>
    %cst_12 = arith.constant dense<0.000000e+00> : vector<16x128xf32>
    %12 = tpu.matmul %11, %6, %cst_12 {dimension_numbers = #tpu.dot_dimension_numbers<[1], [0], [0], [1], [0, 0, 1, 1], [], []>} : vector<16x32xbf16>, vector<32x128xbf16>, vector<16x128xf32> -> vector<16x128xf32>
    %13 = arith.addf %10, %12 : vector<16x128xf32>
    %14 = arith.negf %13 : vector<16x128xf32>
    %15 = math.exp %14 : vector<16x128xf32>
    %cst_13 = arith.constant 1.000000e+00 : f32
    %16 = vector.broadcast %cst_13 : f32 to vector<16x128xf32>
    %17 = arith.addf %16, %15 : vector<16x128xf32>
    %18 = arith.divf %16, %17 : vector<16x128xf32>
    %19 = math.tanh %13 : vector<16x128xf32>
    %20 = vector.extract_strided_slice %18 {offsets = [0, 0], sizes = [16, 32], strides = [1, 1]} : vector<16x128xf32> to vector<16x32xf32>
    %21 = vector.extract_strided_slice %18 {offsets = [0, 32], sizes = [16, 32], strides = [1, 1]} : vector<16x128xf32> to vector<16x32xf32>
    %22 = vector.extract_strided_slice %19 {offsets = [0, 64], sizes = [16, 32], strides = [1, 1]} : vector<16x128xf32> to vector<16x32xf32>
    %23 = vector.extract_strided_slice %18 {offsets = [0, 96], sizes = [16, 32], strides = [1, 1]} : vector<16x128xf32> to vector<16x32xf32>
    %24 = arith.mulf %21, %9 : vector<16x32xf32>
    %25 = arith.mulf %20, %22 : vector<16x32xf32>
    %26 = arith.addf %24, %25 : vector<16x32xf32>
    %27 = math.tanh %26 : vector<16x32xf32>
    %28 = arith.mulf %23, %27 : vector<16x32xf32>
    %29 = tpu.concatenate %28, %9 in 1 : vector<16x32xf32>, vector<16x32xf32> -> vector<16x64xf32>
    %30 = arith.truncf %29 : vector<16x64xf32> to vector<16x64xbf16>
    %cst_14 = arith.constant dense<0.000000e+00> : vector<16x128xf32>
    %31 = tpu.matmul %30, %7, %cst_14 {dimension_numbers = #tpu.dot_dimension_numbers<[1], [0], [0], [1], [0, 0, 1, 1], [], []>} : vector<16x64xbf16>, vector<64x128xbf16>, vector<16x128xf32> -> vector<16x128xf32>
    %32 = vector.broadcast %8 : vector<1x128xf32> to vector<16x128xf32>
    %33 = arith.addf %31, %32 : vector<16x128xf32>
    %34 = arith.negf %33 : vector<16x128xf32>
    %35 = math.exp %34 : vector<16x128xf32>
    %cst_15 = arith.constant 1.000000e+00 : f32
    %36 = vector.broadcast %cst_15 : f32 to vector<16x128xf32>
    %37 = arith.addf %36, %35 : vector<16x128xf32>
    %38 = arith.divf %36, %37 : vector<16x128xf32>
    %39 = math.tanh %33 : vector<16x128xf32>
    %40 = vector.extract_strided_slice %38 {offsets = [0, 0], sizes = [16, 32], strides = [1, 1]} : vector<16x128xf32> to vector<16x32xf32>
    %41 = vector.extract_strided_slice %38 {offsets = [0, 32], sizes = [16, 32], strides = [1, 1]} : vector<16x128xf32> to vector<16x32xf32>
    %42 = vector.extract_strided_slice %39 {offsets = [0, 64], sizes = [16, 32], strides = [1, 1]} : vector<16x128xf32> to vector<16x32xf32>
    %43 = vector.extract_strided_slice %38 {offsets = [0, 96], sizes = [16, 32], strides = [1, 1]} : vector<16x128xf32> to vector<16x32xf32>
    %44 = arith.mulf %41, %9 : vector<16x32xf32>
    %45 = arith.mulf %40, %42 : vector<16x32xf32>
    %46 = arith.addf %44, %45 : vector<16x32xf32>
    %47 = math.tanh %46 : vector<16x32xf32>
    %48 = arith.mulf %43, %47 : vector<16x32xf32>
    %49 = vector.extract_strided_slice %5 {offsets = [16, 0], sizes = [16, 128], strides = [1, 1]} : vector<128x128xf32> to vector<16x128xf32>
    %50 = arith.truncf %28 : vector<16x32xf32> to vector<16x32xbf16>
    %cst_16 = arith.constant dense<0.000000e+00> : vector<16x128xf32>
    %51 = tpu.matmul %50, %6, %cst_16 {dimension_numbers = #tpu.dot_dimension_numbers<[1], [0], [0], [1], [0, 0, 1, 1], [], []>} : vector<16x32xbf16>, vector<32x128xbf16>, vector<16x128xf32> -> vector<16x128xf32>
    %52 = arith.addf %49, %51 : vector<16x128xf32>
    %53 = arith.negf %52 : vector<16x128xf32>
    %54 = math.exp %53 : vector<16x128xf32>
    %cst_17 = arith.constant 1.000000e+00 : f32
    %55 = vector.broadcast %cst_17 : f32 to vector<16x128xf32>
    %56 = arith.addf %55, %54 : vector<16x128xf32>
    %57 = arith.divf %55, %56 : vector<16x128xf32>
    %58 = math.tanh %52 : vector<16x128xf32>
    %59 = vector.extract_strided_slice %57 {offsets = [0, 0], sizes = [16, 32], strides = [1, 1]} : vector<16x128xf32> to vector<16x32xf32>
    %60 = vector.extract_strided_slice %57 {offsets = [0, 32], sizes = [16, 32], strides = [1, 1]} : vector<16x128xf32> to vector<16x32xf32>
    %61 = vector.extract_strided_slice %58 {offsets = [0, 64], sizes = [16, 32], strides = [1, 1]} : vector<16x128xf32> to vector<16x32xf32>
    %62 = vector.extract_strided_slice %57 {offsets = [0, 96], sizes = [16, 32], strides = [1, 1]} : vector<16x128xf32> to vector<16x32xf32>
    %63 = arith.mulf %60, %26 : vector<16x32xf32>
    %64 = arith.mulf %59, %61 : vector<16x32xf32>
    %65 = arith.addf %63, %64 : vector<16x32xf32>
    %66 = math.tanh %65 : vector<16x32xf32>
    %67 = arith.mulf %62, %66 : vector<16x32xf32>
    %68 = tpu.concatenate %67, %48 in 1 : vector<16x32xf32>, vector<16x32xf32> -> vector<16x64xf32>
    %69 = arith.truncf %68 : vector<16x64xf32> to vector<16x64xbf16>
    %cst_18 = arith.constant dense<0.000000e+00> : vector<16x128xf32>
    %70 = tpu.matmul %69, %7, %cst_18 {dimension_numbers = #tpu.dot_dimension_numbers<[1], [0], [0], [1], [0, 0, 1, 1], [], []>} : vector<16x64xbf16>, vector<64x128xbf16>, vector<16x128xf32> -> vector<16x128xf32>
    %71 = vector.broadcast %8 : vector<1x128xf32> to vector<16x128xf32>
    %72 = arith.addf %70, %71 : vector<16x128xf32>
    %73 = arith.negf %72 : vector<16x128xf32>
    %74 = math.exp %73 : vector<16x128xf32>
    %cst_19 = arith.constant 1.000000e+00 : f32
    %75 = vector.broadcast %cst_19 : f32 to vector<16x128xf32>
    %76 = arith.addf %75, %74 : vector<16x128xf32>
    %77 = arith.divf %75, %76 : vector<16x128xf32>
    %78 = math.tanh %72 : vector<16x128xf32>
    %79 = vector.extract_strided_slice %77 {offsets = [0, 0], sizes = [16, 32], strides = [1, 1]} : vector<16x128xf32> to vector<16x32xf32>
    %80 = vector.extract_strided_slice %77 {offsets = [0, 32], sizes = [16, 32], strides = [1, 1]} : vector<16x128xf32> to vector<16x32xf32>
    %81 = vector.extract_strided_slice %78 {offsets = [0, 64], sizes = [16, 32], strides = [1, 1]} : vector<16x128xf32> to vector<16x32xf32>
    %82 = vector.extract_strided_slice %77 {offsets = [0, 96], sizes = [16, 32], strides = [1, 1]} : vector<16x128xf32> to vector<16x32xf32>
    %83 = arith.mulf %80, %46 : vector<16x32xf32>
    %84 = arith.mulf %79, %81 : vector<16x32xf32>
    %85 = arith.addf %83, %84 : vector<16x32xf32>
    %86 = math.tanh %85 : vector<16x32xf32>
    %87 = arith.mulf %82, %86 : vector<16x32xf32>
    %88 = vector.extract_strided_slice %5 {offsets = [32, 0], sizes = [16, 128], strides = [1, 1]} : vector<128x128xf32> to vector<16x128xf32>
    %89 = arith.truncf %67 : vector<16x32xf32> to vector<16x32xbf16>
    %cst_20 = arith.constant dense<0.000000e+00> : vector<16x128xf32>
    %90 = tpu.matmul %89, %6, %cst_20 {dimension_numbers = #tpu.dot_dimension_numbers<[1], [0], [0], [1], [0, 0, 1, 1], [], []>} : vector<16x32xbf16>, vector<32x128xbf16>, vector<16x128xf32> -> vector<16x128xf32>
    %91 = arith.addf %88, %90 : vector<16x128xf32>
    %92 = arith.negf %91 : vector<16x128xf32>
    %93 = math.exp %92 : vector<16x128xf32>
    %cst_21 = arith.constant 1.000000e+00 : f32
    %94 = vector.broadcast %cst_21 : f32 to vector<16x128xf32>
    %95 = arith.addf %94, %93 : vector<16x128xf32>
    %96 = arith.divf %94, %95 : vector<16x128xf32>
    %97 = math.tanh %91 : vector<16x128xf32>
    %98 = vector.extract_strided_slice %96 {offsets = [0, 0], sizes = [16, 32], strides = [1, 1]} : vector<16x128xf32> to vector<16x32xf32>
    %99 = vector.extract_strided_slice %96 {offsets = [0, 32], sizes = [16, 32], strides = [1, 1]} : vector<16x128xf32> to vector<16x32xf32>
    %100 = vector.extract_strided_slice %97 {offsets = [0, 64], sizes = [16, 32], strides = [1, 1]} : vector<16x128xf32> to vector<16x32xf32>
    %101 = vector.extract_strided_slice %96 {offsets = [0, 96], sizes = [16, 32], strides = [1, 1]} : vector<16x128xf32> to vector<16x32xf32>
    %102 = arith.mulf %99, %65 : vector<16x32xf32>
    %103 = arith.mulf %98, %100 : vector<16x32xf32>
    %104 = arith.addf %102, %103 : vector<16x32xf32>
    %105 = math.tanh %104 : vector<16x32xf32>
    %106 = arith.mulf %101, %105 : vector<16x32xf32>
    %107 = tpu.concatenate %106, %87 in 1 : vector<16x32xf32>, vector<16x32xf32> -> vector<16x64xf32>
    %108 = arith.truncf %107 : vector<16x64xf32> to vector<16x64xbf16>
    %cst_22 = arith.constant dense<0.000000e+00> : vector<16x128xf32>
    %109 = tpu.matmul %108, %7, %cst_22 {dimension_numbers = #tpu.dot_dimension_numbers<[1], [0], [0], [1], [0, 0, 1, 1], [], []>} : vector<16x64xbf16>, vector<64x128xbf16>, vector<16x128xf32> -> vector<16x128xf32>
    %110 = vector.broadcast %8 : vector<1x128xf32> to vector<16x128xf32>
    %111 = arith.addf %109, %110 : vector<16x128xf32>
    %112 = arith.negf %111 : vector<16x128xf32>
    %113 = math.exp %112 : vector<16x128xf32>
    %cst_23 = arith.constant 1.000000e+00 : f32
    %114 = vector.broadcast %cst_23 : f32 to vector<16x128xf32>
    %115 = arith.addf %114, %113 : vector<16x128xf32>
    %116 = arith.divf %114, %115 : vector<16x128xf32>
    %117 = math.tanh %111 : vector<16x128xf32>
    %118 = vector.extract_strided_slice %116 {offsets = [0, 0], sizes = [16, 32], strides = [1, 1]} : vector<16x128xf32> to vector<16x32xf32>
    %119 = vector.extract_strided_slice %116 {offsets = [0, 32], sizes = [16, 32], strides = [1, 1]} : vector<16x128xf32> to vector<16x32xf32>
    %120 = vector.extract_strided_slice %117 {offsets = [0, 64], sizes = [16, 32], strides = [1, 1]} : vector<16x128xf32> to vector<16x32xf32>
    %121 = vector.extract_strided_slice %116 {offsets = [0, 96], sizes = [16, 32], strides = [1, 1]} : vector<16x128xf32> to vector<16x32xf32>
    %122 = arith.mulf %119, %85 : vector<16x32xf32>
    %123 = arith.mulf %118, %120 : vector<16x32xf32>
    %124 = arith.addf %122, %123 : vector<16x32xf32>
    %125 = math.tanh %124 : vector<16x32xf32>
    %126 = arith.mulf %121, %125 : vector<16x32xf32>
    %127 = vector.extract_strided_slice %5 {offsets = [48, 0], sizes = [16, 128], strides = [1, 1]} : vector<128x128xf32> to vector<16x128xf32>
    %128 = arith.truncf %106 : vector<16x32xf32> to vector<16x32xbf16>
    %cst_24 = arith.constant dense<0.000000e+00> : vector<16x128xf32>
    %129 = tpu.matmul %128, %6, %cst_24 {dimension_numbers = #tpu.dot_dimension_numbers<[1], [0], [0], [1], [0, 0, 1, 1], [], []>} : vector<16x32xbf16>, vector<32x128xbf16>, vector<16x128xf32> -> vector<16x128xf32>
    %130 = arith.addf %127, %129 : vector<16x128xf32>
    %131 = arith.negf %130 : vector<16x128xf32>
    %132 = math.exp %131 : vector<16x128xf32>
    %cst_25 = arith.constant 1.000000e+00 : f32
    %133 = vector.broadcast %cst_25 : f32 to vector<16x128xf32>
    %134 = arith.addf %133, %132 : vector<16x128xf32>
    %135 = arith.divf %133, %134 : vector<16x128xf32>
    %136 = math.tanh %130 : vector<16x128xf32>
    %137 = vector.extract_strided_slice %135 {offsets = [0, 0], sizes = [16, 32], strides = [1, 1]} : vector<16x128xf32> to vector<16x32xf32>
    %138 = vector.extract_strided_slice %135 {offsets = [0, 32], sizes = [16, 32], strides = [1, 1]} : vector<16x128xf32> to vector<16x32xf32>
    %139 = vector.extract_strided_slice %136 {offsets = [0, 64], sizes = [16, 32], strides = [1, 1]} : vector<16x128xf32> to vector<16x32xf32>
    %140 = vector.extract_strided_slice %135 {offsets = [0, 96], sizes = [16, 32], strides = [1, 1]} : vector<16x128xf32> to vector<16x32xf32>
    %141 = arith.mulf %138, %104 : vector<16x32xf32>
    %142 = arith.mulf %137, %139 : vector<16x32xf32>
    %143 = arith.addf %141, %142 : vector<16x32xf32>
    %144 = math.tanh %143 : vector<16x32xf32>
    %145 = arith.mulf %140, %144 : vector<16x32xf32>
    %146 = tpu.concatenate %145, %126 in 1 : vector<16x32xf32>, vector<16x32xf32> -> vector<16x64xf32>
    %147 = arith.truncf %146 : vector<16x64xf32> to vector<16x64xbf16>
    %cst_26 = arith.constant dense<0.000000e+00> : vector<16x128xf32>
    %148 = tpu.matmul %147, %7, %cst_26 {dimension_numbers = #tpu.dot_dimension_numbers<[1], [0], [0], [1], [0, 0, 1, 1], [], []>} : vector<16x64xbf16>, vector<64x128xbf16>, vector<16x128xf32> -> vector<16x128xf32>
    %149 = vector.broadcast %8 : vector<1x128xf32> to vector<16x128xf32>
    %150 = arith.addf %148, %149 : vector<16x128xf32>
    %151 = arith.negf %150 : vector<16x128xf32>
    %152 = math.exp %151 : vector<16x128xf32>
    %cst_27 = arith.constant 1.000000e+00 : f32
    %153 = vector.broadcast %cst_27 : f32 to vector<16x128xf32>
    %154 = arith.addf %153, %152 : vector<16x128xf32>
    %155 = arith.divf %153, %154 : vector<16x128xf32>
    %156 = math.tanh %150 : vector<16x128xf32>
    %157 = vector.extract_strided_slice %155 {offsets = [0, 0], sizes = [16, 32], strides = [1, 1]} : vector<16x128xf32> to vector<16x32xf32>
    %158 = vector.extract_strided_slice %155 {offsets = [0, 32], sizes = [16, 32], strides = [1, 1]} : vector<16x128xf32> to vector<16x32xf32>
    %159 = vector.extract_strided_slice %156 {offsets = [0, 64], sizes = [16, 32], strides = [1, 1]} : vector<16x128xf32> to vector<16x32xf32>
    %160 = vector.extract_strided_slice %155 {offsets = [0, 96], sizes = [16, 32], strides = [1, 1]} : vector<16x128xf32> to vector<16x32xf32>
    %161 = arith.mulf %158, %124 : vector<16x32xf32>
    %162 = arith.mulf %157, %159 : vector<16x32xf32>
    %163 = arith.addf %161, %162 : vector<16x32xf32>
    %164 = math.tanh %163 : vector<16x32xf32>
    %165 = arith.mulf %160, %164 : vector<16x32xf32>
    %166 = vector.extract_strided_slice %5 {offsets = [64, 0], sizes = [16, 128], strides = [1, 1]} : vector<128x128xf32> to vector<16x128xf32>
    %167 = arith.truncf %145 : vector<16x32xf32> to vector<16x32xbf16>
    %cst_28 = arith.constant dense<0.000000e+00> : vector<16x128xf32>
    %168 = tpu.matmul %167, %6, %cst_28 {dimension_numbers = #tpu.dot_dimension_numbers<[1], [0], [0], [1], [0, 0, 1, 1], [], []>} : vector<16x32xbf16>, vector<32x128xbf16>, vector<16x128xf32> -> vector<16x128xf32>
    %169 = arith.addf %166, %168 : vector<16x128xf32>
    %170 = arith.negf %169 : vector<16x128xf32>
    %171 = math.exp %170 : vector<16x128xf32>
    %cst_29 = arith.constant 1.000000e+00 : f32
    %172 = vector.broadcast %cst_29 : f32 to vector<16x128xf32>
    %173 = arith.addf %172, %171 : vector<16x128xf32>
    %174 = arith.divf %172, %173 : vector<16x128xf32>
    %175 = math.tanh %169 : vector<16x128xf32>
    %176 = vector.extract_strided_slice %174 {offsets = [0, 0], sizes = [16, 32], strides = [1, 1]} : vector<16x128xf32> to vector<16x32xf32>
    %177 = vector.extract_strided_slice %174 {offsets = [0, 32], sizes = [16, 32], strides = [1, 1]} : vector<16x128xf32> to vector<16x32xf32>
    %178 = vector.extract_strided_slice %175 {offsets = [0, 64], sizes = [16, 32], strides = [1, 1]} : vector<16x128xf32> to vector<16x32xf32>
    %179 = vector.extract_strided_slice %174 {offsets = [0, 96], sizes = [16, 32], strides = [1, 1]} : vector<16x128xf32> to vector<16x32xf32>
    %180 = arith.mulf %177, %143 : vector<16x32xf32>
    %181 = arith.mulf %176, %178 : vector<16x32xf32>
    %182 = arith.addf %180, %181 : vector<16x32xf32>
    %183 = math.tanh %182 : vector<16x32xf32>
    %184 = arith.mulf %179, %183 : vector<16x32xf32>
    %185 = tpu.concatenate %184, %165 in 1 : vector<16x32xf32>, vector<16x32xf32> -> vector<16x64xf32>
    %186 = arith.truncf %185 : vector<16x64xf32> to vector<16x64xbf16>
    %cst_30 = arith.constant dense<0.000000e+00> : vector<16x128xf32>
    %187 = tpu.matmul %186, %7, %cst_30 {dimension_numbers = #tpu.dot_dimension_numbers<[1], [0], [0], [1], [0, 0, 1, 1], [], []>} : vector<16x64xbf16>, vector<64x128xbf16>, vector<16x128xf32> -> vector<16x128xf32>
    %188 = vector.broadcast %8 : vector<1x128xf32> to vector<16x128xf32>
    %189 = arith.addf %187, %188 : vector<16x128xf32>
    %190 = arith.negf %189 : vector<16x128xf32>
    %191 = math.exp %190 : vector<16x128xf32>
    %cst_31 = arith.constant 1.000000e+00 : f32
    %192 = vector.broadcast %cst_31 : f32 to vector<16x128xf32>
    %193 = arith.addf %192, %191 : vector<16x128xf32>
    %194 = arith.divf %192, %193 : vector<16x128xf32>
    %195 = math.tanh %189 : vector<16x128xf32>
    %196 = vector.extract_strided_slice %194 {offsets = [0, 0], sizes = [16, 32], strides = [1, 1]} : vector<16x128xf32> to vector<16x32xf32>
    %197 = vector.extract_strided_slice %194 {offsets = [0, 32], sizes = [16, 32], strides = [1, 1]} : vector<16x128xf32> to vector<16x32xf32>
    %198 = vector.extract_strided_slice %195 {offsets = [0, 64], sizes = [16, 32], strides = [1, 1]} : vector<16x128xf32> to vector<16x32xf32>
    %199 = vector.extract_strided_slice %194 {offsets = [0, 96], sizes = [16, 32], strides = [1, 1]} : vector<16x128xf32> to vector<16x32xf32>
    %200 = arith.mulf %197, %163 : vector<16x32xf32>
    %201 = arith.mulf %196, %198 : vector<16x32xf32>
    %202 = arith.addf %200, %201 : vector<16x32xf32>
    %203 = math.tanh %202 : vector<16x32xf32>
    %204 = arith.mulf %199, %203 : vector<16x32xf32>
    %205 = vector.extract_strided_slice %5 {offsets = [80, 0], sizes = [16, 128], strides = [1, 1]} : vector<128x128xf32> to vector<16x128xf32>
    %206 = arith.truncf %184 : vector<16x32xf32> to vector<16x32xbf16>
    %cst_32 = arith.constant dense<0.000000e+00> : vector<16x128xf32>
    %207 = tpu.matmul %206, %6, %cst_32 {dimension_numbers = #tpu.dot_dimension_numbers<[1], [0], [0], [1], [0, 0, 1, 1], [], []>} : vector<16x32xbf16>, vector<32x128xbf16>, vector<16x128xf32> -> vector<16x128xf32>
    %208 = arith.addf %205, %207 : vector<16x128xf32>
    %209 = arith.negf %208 : vector<16x128xf32>
    %210 = math.exp %209 : vector<16x128xf32>
    %cst_33 = arith.constant 1.000000e+00 : f32
    %211 = vector.broadcast %cst_33 : f32 to vector<16x128xf32>
    %212 = arith.addf %211, %210 : vector<16x128xf32>
    %213 = arith.divf %211, %212 : vector<16x128xf32>
    %214 = math.tanh %208 : vector<16x128xf32>
    %215 = vector.extract_strided_slice %213 {offsets = [0, 0], sizes = [16, 32], strides = [1, 1]} : vector<16x128xf32> to vector<16x32xf32>
    %216 = vector.extract_strided_slice %213 {offsets = [0, 32], sizes = [16, 32], strides = [1, 1]} : vector<16x128xf32> to vector<16x32xf32>
    %217 = vector.extract_strided_slice %214 {offsets = [0, 64], sizes = [16, 32], strides = [1, 1]} : vector<16x128xf32> to vector<16x32xf32>
    %218 = vector.extract_strided_slice %213 {offsets = [0, 96], sizes = [16, 32], strides = [1, 1]} : vector<16x128xf32> to vector<16x32xf32>
    %219 = arith.mulf %216, %182 : vector<16x32xf32>
    %220 = arith.mulf %215, %217 : vector<16x32xf32>
    %221 = arith.addf %219, %220 : vector<16x32xf32>
    %222 = math.tanh %221 : vector<16x32xf32>
    %223 = arith.mulf %218, %222 : vector<16x32xf32>
    %224 = tpu.concatenate %223, %204 in 1 : vector<16x32xf32>, vector<16x32xf32> -> vector<16x64xf32>
    %225 = arith.truncf %224 : vector<16x64xf32> to vector<16x64xbf16>
    %cst_34 = arith.constant dense<0.000000e+00> : vector<16x128xf32>
    %226 = tpu.matmul %225, %7, %cst_34 {dimension_numbers = #tpu.dot_dimension_numbers<[1], [0], [0], [1], [0, 0, 1, 1], [], []>} : vector<16x64xbf16>, vector<64x128xbf16>, vector<16x128xf32> -> vector<16x128xf32>
    %227 = vector.broadcast %8 : vector<1x128xf32> to vector<16x128xf32>
    %228 = arith.addf %226, %227 : vector<16x128xf32>
    %229 = arith.negf %228 : vector<16x128xf32>
    %230 = math.exp %229 : vector<16x128xf32>
    %cst_35 = arith.constant 1.000000e+00 : f32
    %231 = vector.broadcast %cst_35 : f32 to vector<16x128xf32>
    %232 = arith.addf %231, %230 : vector<16x128xf32>
    %233 = arith.divf %231, %232 : vector<16x128xf32>
    %234 = math.tanh %228 : vector<16x128xf32>
    %235 = vector.extract_strided_slice %233 {offsets = [0, 0], sizes = [16, 32], strides = [1, 1]} : vector<16x128xf32> to vector<16x32xf32>
    %236 = vector.extract_strided_slice %233 {offsets = [0, 32], sizes = [16, 32], strides = [1, 1]} : vector<16x128xf32> to vector<16x32xf32>
    %237 = vector.extract_strided_slice %234 {offsets = [0, 64], sizes = [16, 32], strides = [1, 1]} : vector<16x128xf32> to vector<16x32xf32>
    %238 = vector.extract_strided_slice %233 {offsets = [0, 96], sizes = [16, 32], strides = [1, 1]} : vector<16x128xf32> to vector<16x32xf32>
    %239 = arith.mulf %236, %202 : vector<16x32xf32>
    %240 = arith.mulf %235, %237 : vector<16x32xf32>
    %241 = arith.addf %239, %240 : vector<16x32xf32>
    %242 = math.tanh %241 : vector<16x32xf32>
    %243 = arith.mulf %238, %242 : vector<16x32xf32>
    %244 = vector.extract_strided_slice %5 {offsets = [96, 0], sizes = [16, 128], strides = [1, 1]} : vector<128x128xf32> to vector<16x128xf32>
    %245 = arith.truncf %223 : vector<16x32xf32> to vector<16x32xbf16>
    %cst_36 = arith.constant dense<0.000000e+00> : vector<16x128xf32>
    %246 = tpu.matmul %245, %6, %cst_36 {dimension_numbers = #tpu.dot_dimension_numbers<[1], [0], [0], [1], [0, 0, 1, 1], [], []>} : vector<16x32xbf16>, vector<32x128xbf16>, vector<16x128xf32> -> vector<16x128xf32>
    %247 = arith.addf %244, %246 : vector<16x128xf32>
    %248 = arith.negf %247 : vector<16x128xf32>
    %249 = math.exp %248 : vector<16x128xf32>
    %cst_37 = arith.constant 1.000000e+00 : f32
    %250 = vector.broadcast %cst_37 : f32 to vector<16x128xf32>
    %251 = arith.addf %250, %249 : vector<16x128xf32>
    %252 = arith.divf %250, %251 : vector<16x128xf32>
    %253 = math.tanh %247 : vector<16x128xf32>
    %254 = vector.extract_strided_slice %252 {offsets = [0, 0], sizes = [16, 32], strides = [1, 1]} : vector<16x128xf32> to vector<16x32xf32>
    %255 = vector.extract_strided_slice %252 {offsets = [0, 32], sizes = [16, 32], strides = [1, 1]} : vector<16x128xf32> to vector<16x32xf32>
    %256 = vector.extract_strided_slice %253 {offsets = [0, 64], sizes = [16, 32], strides = [1, 1]} : vector<16x128xf32> to vector<16x32xf32>
    %257 = vector.extract_strided_slice %252 {offsets = [0, 96], sizes = [16, 32], strides = [1, 1]} : vector<16x128xf32> to vector<16x32xf32>
    %258 = arith.mulf %255, %221 : vector<16x32xf32>
    %259 = arith.mulf %254, %256 : vector<16x32xf32>
    %260 = arith.addf %258, %259 : vector<16x32xf32>
    %261 = math.tanh %260 : vector<16x32xf32>
    %262 = arith.mulf %257, %261 : vector<16x32xf32>
    %263 = tpu.concatenate %262, %243 in 1 : vector<16x32xf32>, vector<16x32xf32> -> vector<16x64xf32>
    %264 = arith.truncf %263 : vector<16x64xf32> to vector<16x64xbf16>
    %cst_38 = arith.constant dense<0.000000e+00> : vector<16x128xf32>
    %265 = tpu.matmul %264, %7, %cst_38 {dimension_numbers = #tpu.dot_dimension_numbers<[1], [0], [0], [1], [0, 0, 1, 1], [], []>} : vector<16x64xbf16>, vector<64x128xbf16>, vector<16x128xf32> -> vector<16x128xf32>
    %266 = vector.broadcast %8 : vector<1x128xf32> to vector<16x128xf32>
    %267 = arith.addf %265, %266 : vector<16x128xf32>
    %268 = arith.negf %267 : vector<16x128xf32>
    %269 = math.exp %268 : vector<16x128xf32>
    %cst_39 = arith.constant 1.000000e+00 : f32
    %270 = vector.broadcast %cst_39 : f32 to vector<16x128xf32>
    %271 = arith.addf %270, %269 : vector<16x128xf32>
    %272 = arith.divf %270, %271 : vector<16x128xf32>
    %273 = math.tanh %267 : vector<16x128xf32>
    %274 = vector.extract_strided_slice %272 {offsets = [0, 0], sizes = [16, 32], strides = [1, 1]} : vector<16x128xf32> to vector<16x32xf32>
    %275 = vector.extract_strided_slice %272 {offsets = [0, 32], sizes = [16, 32], strides = [1, 1]} : vector<16x128xf32> to vector<16x32xf32>
    %276 = vector.extract_strided_slice %273 {offsets = [0, 64], sizes = [16, 32], strides = [1, 1]} : vector<16x128xf32> to vector<16x32xf32>
    %277 = vector.extract_strided_slice %272 {offsets = [0, 96], sizes = [16, 32], strides = [1, 1]} : vector<16x128xf32> to vector<16x32xf32>
    %278 = arith.mulf %275, %241 : vector<16x32xf32>
    %279 = arith.mulf %274, %276 : vector<16x32xf32>
    %280 = arith.addf %278, %279 : vector<16x32xf32>
    %281 = math.tanh %280 : vector<16x32xf32>
    %282 = arith.mulf %277, %281 : vector<16x32xf32>
    %283 = vector.extract_strided_slice %5 {offsets = [112, 0], sizes = [16, 128], strides = [1, 1]} : vector<128x128xf32> to vector<16x128xf32>
    %284 = arith.truncf %262 : vector<16x32xf32> to vector<16x32xbf16>
    %cst_40 = arith.constant dense<0.000000e+00> : vector<16x128xf32>
    %285 = tpu.matmul %284, %6, %cst_40 {dimension_numbers = #tpu.dot_dimension_numbers<[1], [0], [0], [1], [0, 0, 1, 1], [], []>} : vector<16x32xbf16>, vector<32x128xbf16>, vector<16x128xf32> -> vector<16x128xf32>
    %286 = arith.addf %283, %285 : vector<16x128xf32>
    %287 = arith.negf %286 : vector<16x128xf32>
    %288 = math.exp %287 : vector<16x128xf32>
    %cst_41 = arith.constant 1.000000e+00 : f32
    %289 = vector.broadcast %cst_41 : f32 to vector<16x128xf32>
    %290 = arith.addf %289, %288 : vector<16x128xf32>
    %291 = arith.divf %289, %290 : vector<16x128xf32>
    %292 = math.tanh %286 : vector<16x128xf32>
    %293 = vector.extract_strided_slice %291 {offsets = [0, 0], sizes = [16, 32], strides = [1, 1]} : vector<16x128xf32> to vector<16x32xf32>
    %294 = vector.extract_strided_slice %291 {offsets = [0, 32], sizes = [16, 32], strides = [1, 1]} : vector<16x128xf32> to vector<16x32xf32>
    %295 = vector.extract_strided_slice %292 {offsets = [0, 64], sizes = [16, 32], strides = [1, 1]} : vector<16x128xf32> to vector<16x32xf32>
    %296 = vector.extract_strided_slice %291 {offsets = [0, 96], sizes = [16, 32], strides = [1, 1]} : vector<16x128xf32> to vector<16x32xf32>
    %297 = arith.mulf %294, %260 : vector<16x32xf32>
    %298 = arith.mulf %293, %295 : vector<16x32xf32>
    %299 = arith.addf %297, %298 : vector<16x32xf32>
    %300 = math.tanh %299 : vector<16x32xf32>
    %301 = arith.mulf %296, %300 : vector<16x32xf32>
    %302 = tpu.concatenate %301, %282 in 1 : vector<16x32xf32>, vector<16x32xf32> -> vector<16x64xf32>
    %303 = arith.truncf %302 : vector<16x64xf32> to vector<16x64xbf16>
    %cst_42 = arith.constant dense<0.000000e+00> : vector<16x128xf32>
    %304 = tpu.matmul %303, %7, %cst_42 {dimension_numbers = #tpu.dot_dimension_numbers<[1], [0], [0], [1], [0, 0, 1, 1], [], []>} : vector<16x64xbf16>, vector<64x128xbf16>, vector<16x128xf32> -> vector<16x128xf32>
    %305 = vector.broadcast %8 : vector<1x128xf32> to vector<16x128xf32>
    %306 = arith.addf %304, %305 : vector<16x128xf32>
    %307 = arith.negf %306 : vector<16x128xf32>
    %308 = math.exp %307 : vector<16x128xf32>
    %cst_43 = arith.constant 1.000000e+00 : f32
    %309 = vector.broadcast %cst_43 : f32 to vector<16x128xf32>
    %310 = arith.addf %309, %308 : vector<16x128xf32>
    %311 = arith.divf %309, %310 : vector<16x128xf32>
    %312 = math.tanh %306 : vector<16x128xf32>
    %313 = vector.extract_strided_slice %311 {offsets = [0, 0], sizes = [16, 32], strides = [1, 1]} : vector<16x128xf32> to vector<16x32xf32>
    %314 = vector.extract_strided_slice %311 {offsets = [0, 32], sizes = [16, 32], strides = [1, 1]} : vector<16x128xf32> to vector<16x32xf32>
    %315 = vector.extract_strided_slice %312 {offsets = [0, 64], sizes = [16, 32], strides = [1, 1]} : vector<16x128xf32> to vector<16x32xf32>
    %316 = vector.extract_strided_slice %311 {offsets = [0, 96], sizes = [16, 32], strides = [1, 1]} : vector<16x128xf32> to vector<16x32xf32>
    %317 = arith.mulf %314, %280 : vector<16x32xf32>
    %318 = arith.mulf %313, %315 : vector<16x32xf32>
    %319 = arith.addf %317, %318 : vector<16x32xf32>
    %320 = math.tanh %319 : vector<16x32xf32>
    %321 = arith.mulf %316, %320 : vector<16x32xf32>
    %322 = arith.truncf %321 : vector<16x32xf32> to vector<16x32xbf16>
    %c0_44 = arith.constant 0 : index
    %c0_45 = arith.constant 0 : index
    %323 = vector.load %arg7[%c0_44, %c0_45] : memref<32x32xbf16, #tpu.memory_space<vmem>>, vector<32x32xbf16>
    %cst_46 = arith.constant dense<0.000000e+00> : vector<16x32xf32>
    %324 = tpu.matmul %322, %323, %cst_46 {dimension_numbers = #tpu.dot_dimension_numbers<[1], [0], [0], [1], [0, 0, 1, 1], [], []>} : vector<16x32xbf16>, vector<32x32xbf16>, vector<16x32xf32> -> vector<16x32xf32>
    %c0_47 = arith.constant 0 : index
    %c0_48 = arith.constant 0 : index
    %325 = vector.load %arg8[%c0_47, %c0_48] : memref<1x32xf32, #tpu.memory_space<vmem>>, vector<1x32xf32>
    %326 = vector.broadcast %325 : vector<1x32xf32> to vector<16x32xf32>
    %327 = arith.addf %324, %326 : vector<16x32xf32>
    %328 = arith.mulf %327, %327 : vector<16x32xf32>
    %cst_49 = arith.constant dense<0.000000e+00> : vector<16xf32>
    %329 = vector.multi_reduction <add>, %328, %cst_49 [1] : vector<16x32xf32> to vector<16xf32>
    %330 = vector.shape_cast %329 : vector<16xf32> to vector<16x1xf32>
    %331 = tpu.iota {dimensions = array<i32: 0>} : vector<16x1xi32>
    %c9_i32 = arith.constant 9 : i32
    %332 = vector.broadcast %c9_i32 : i32 to vector<16x1xi32>
    %333 = arith.cmpi slt, %331, %332 : vector<16x1xi32>
    %334 = math.rsqrt %330 : vector<16x1xf32>
    %cst_50 = arith.constant 0.000000e+00 : f32
    %335 = vector.broadcast %cst_50 : f32 to vector<16x1xf32>
    %336 = arith.select %333, %334, %335 : vector<16x1xi1>, vector<16x1xf32>
    %337 = vector.broadcast %336 : vector<16x1xf32> to vector<16x32xf32>
    %338 = arith.mulf %327, %337 : vector<16x32xf32>
    %cst_51 = arith.constant dense<0.000000e+00> : vector<32xf32>
    %339 = vector.multi_reduction <add>, %338, %cst_51 [0] : vector<16x32xf32> to vector<32xf32>
    %340 = vector.shape_cast %339 : vector<32xf32> to vector<1x32xf32>
    %cst_52 = arith.constant 0.111111112 : f32
    %341 = vector.broadcast %cst_52 : f32 to vector<1x32xf32>
    %342 = arith.mulf %340, %341 : vector<1x32xf32>
    %c0_53 = arith.constant 0 : index
    %c0_54 = arith.constant 0 : index
    %343 = vector.load %arg9[%c0_53, %c0_54] : memref<1x32xf32, #tpu.memory_space<vmem>>, vector<1x32xf32>
    tpu.vector_store %arg9[%c0_53, %c0_54], %342 {strides = array<i32>} : memref<1x32xf32, #tpu.memory_space<vmem>>, vector<1x32xf32>,
    return
  }
  func.func @transform_0(%arg0: i32) -> (i32, i32) {
    %c0_i32 = arith.constant 0 : i32
    %c0_i32_0 = arith.constant 0 : i32
    %c0_i32_1 = arith.constant 0 : i32
    return %c0_i32, %c0_i32_0 : i32, i32
  }
  func.func @transform_1(%arg0: i32) -> (i32, i32) {
    %c0_i32 = arith.constant 0 : i32
    %c0_i32_0 = arith.constant 0 : i32
    %c0_i32_1 = arith.constant 0 : i32
    return %c0_i32, %c0_i32_0 : i32, i32
  }
  func.func @transform_2(%arg0: i32) -> (i32, i32) {
    %c0_i32 = arith.constant 0 : i32
    %c0_i32_0 = arith.constant 0 : i32
    %c0_i32_1 = arith.constant 0 : i32
    return %c0_i32, %c0_i32_0 : i32, i32
  }
  func.func @transform_3(%arg0: i32) -> (i32, i32) {
    %c0_i32 = arith.constant 0 : i32
    %c0_i32_0 = arith.constant 0 : i32
    %c0_i32_1 = arith.constant 0 : i32
    return %c0_i32, %c0_i32_0 : i32, i32
  }
  func.func @transform_4(%arg0: i32) -> (i32, i32) {
    %c0_i32 = arith.constant 0 : i32
    %c0_i32_0 = arith.constant 0 : i32
    %c0_i32_1 = arith.constant 0 : i32
    return %c0_i32, %c0_i32_0 : i32, i32
  }
  func.func @transform_5(%arg0: i32) -> (i32, i32) {
    %c0_i32 = arith.constant 0 : i32
    %c0_i32_0 = arith.constant 0 : i32
    %c0_i32_1 = arith.constant 0 : i32
    return %c0_i32, %c0_i32_0 : i32, i32
  }
  func.func @transform_6(%arg0: i32) -> (i32, i32) {
    %c0_i32 = arith.constant 0 : i32
    %c0_i32_0 = arith.constant 0 : i32
    %c0_i32_1 = arith.constant 0 : i32
    return %c0_i32, %c0_i32_0 : i32, i32
  }
  func.func @transform_7(%arg0: i32) -> (i32, i32) {
    %c0_i32 = arith.constant 0 : i32
    %c0_i32_0 = arith.constant 0 : i32
    %c0_i32_1 = arith.constant 0 : i32
    return %c0_i32, %c0_i32_0 : i32, i32
  }
  func.func @transform_8(%arg0: i32) -> (i32, i32) {
    %c0_i32 = arith.constant 0 : i32
    %c0_i32_0 = arith.constant 0 : i32
    %c0_i32_1 = arith.constant 0 : i32
    return %c0_i32, %c0_i32_0 : i32, i32
  }
}

</mosaic_0001>

<bundles_post_ra>
// kernel: tpu_custom_call.1
= control target key start
LH: loop header
LB: loop body
LE: loop exit
PB: predicated region body
PF: predicated region fallthrough
CT: control target
= control target key end

     0   :  { %v2795_v1 = vmov 0.0   ;;  %vm2796_vm0 = vmmov 0   ;;  %vm110_vm1 = vcmask 261120   ;;  %v2797_v7 = vmov 0   ;;  %s3443_s0 = inlined_call_operand.vmem [shape: bf16[128,32], index: 0, kind: input, shape index: {}]   ;;  %s3444_s1 = inlined_call_operand.vmem [shape: bf16[32,128], index: 1, kind: input, shape index: {}]   ;;  %s3445_s2 = inlined_call_operand.vmem [shape: bf16[32,128], index: 2, kind: input, shape index: {}]   ;;  %s3446_s3 = inlined_call_operand.vmem [shape: f32[1,128], index: 3, kind: input, shape index: {}]   ;;  %s3447_s4 = inlined_call_operand.vmem [shape: bf16[64,128], index: 4, kind: input, shape index: {}]   ;;  %s3448_s5 = inlined_call_operand.vmem [shape: f32[1,128], index: 5, kind: input, shape index: {}]   ;;  %s3449_s6 = inlined_call_operand.vmem [shape: bf16[32,32], index: 6, kind: input, shape index: {}]   ;;  %s3450_s7 = inlined_call_operand.vmem [shape: f32[1,32], index: 7, kind: input, shape index: {}]   ;;  %s3451_s8 = inlined_call_operand.hbm [shape: f32[1,32], index: 8, kind: output, shape index: {}]  }
   0x1   :  { %v2487_v0 = vld [vmem:[%s3444_s1 + $0x8] sm:$0xff]   ;;  %2238 = vmatprep.subr.bf16.mxu1 %v2795_v1  ;;  %v2489_v3 = vld [vmem:[%s3444_s1] sm:$0xff]   ;;  %2242 = vmatprep.mubr.msk.bf16.mxu1 %vm2796_vm0, %v2795_v1 }
   0x2   :  { %v2853_v2 = vld [vmem:[%s3445_s2 + $0x8] sm:$0xff]   ;;  %2218 = vmatprep.subr.bf16.mxu0 %v2487_v0  ;;  %v2864_v4 = vld [vmem:[%s3445_s2] sm:$0xff]  }
   0x3   :  { %2239 = vmatpush3.bf16.msra.mxu1 %v2853_v2  ;;  %2219 = vmatpush3.bf16.msra.mxu0 %v2487_v0  ;;  %v2491_v5 = vld [vmem:[%s3443_s0] sm:$0xff]   ;;  %v2492_v6 = vld [vmem:[%s3443_s0 + $0x8] sm:$0xff]  }
   0x4   :  { %2240 = vmatprep.subr.bf16.mxu1 %v2795_v1  ;;  %2220 = vmatprep.subr.bf16.mxu0 %v2489_v3 }
   0x5   :  { %2222 = vmatprep.mubr.msk.bf16.mxu0 %vm110_vm1, %v2491_v5 }
   0x7   :  { %2241 = vmatpush3.bf16.msra.mxu1 %v2864_v4  ;;  %2221 = vmatpush3.bf16.msra.mxu0 %v2489_v3 }
   0x8   :  { %2246 = vmatprep.subr.bf16.mxu1 %v2795_v1  ;;  %2266 = vmatprep.subr.bf16.mxu0 %v2795_v1 }
   0xa   :  { %2243 = vmatmul.mubr.bf16.vlgmr.msra.gmra.mxu1 %v2797_v7  ;;  %2223 = vmatmul.mubr.msk.bf16.vlgmr.msra.gmra.mxu0 %vm110_vm1, %v2492_v6 }
   0xb   :  { %2254 = vmatprep.mubr.msk.bf16.mxu1 %vm2796_vm0, %v2795_v1 }
   0xc   :  { %13 = vsyncpa [#allocation3], 0  ;;  %v2885_v10 = vld [vmem:[%s3446_s3] ss:$0 sm:$0xff]  ;;  %s2798_s18 = smov 64   ;;  %s2799_s19 = smov 32  }
   0xd   :  { %v2904_v41 = vld [vmem:[%s3447_s4 + $0x18] sm:$0xff]   ;;  %v2910_v42 = vld [vmem:[%s3447_s4 + $0x10] sm:$0xff]   ;;  %v2920_v44 = vld [vmem:[%s3447_s4 + $0x8] sm:$0xff]   ;;  %vm392_vm2 = vcmask 523264   ;;  %vm2048_vm4 = vcmask 253952  }
   0xe   :  { %2247 = vmatpush3.bf16.msra.mxu1 %v2904_v41  ;;  %2267 = vmatpush3.bf16.msra.mxu0 %v2904_v41  ;;  %v2933_v46 = vld [vmem:[%s3447_s4] sm:$0xff]  }
   0xf   :  { %2248 = vmatprep.subr.bf16.mxu1 %v2795_v1  ;;  %2268 = vmatprep.subr.bf16.mxu0 %v2795_v1  ;;  %v2960_v60 = vld [vmem:[%s3448_s5] ss:$0 sm:$0xff] }
  0x12   :  { %2249 = vmatpush3.bf16.msra.mxu1 %v2910_v42  ;;  %2269 = vmatpush3.bf16.msra.mxu0 %v2910_v42 }
  0x13   :  { %2250 = vmatprep.subr.bf16.mxu1 %v2795_v1  ;;  %2270 = vmatprep.subr.bf16.mxu0 %v2795_v1 }
  0x16   :  { %2251 = vmatpush3.bf16.msra.mxu1 %v2920_v44  ;;  %2271 = vmatpush3.bf16.msra.mxu0 %v2920_v44 }
  0x17   :  { %2252 = vmatprep.subr.bf16.mxu1 %v2795_v1  ;;  %2272 = vmatprep.subr.bf16.mxu0 %v2795_v1 }
  0x1a   :  { %2253 = vmatpush3.bf16.msra.mxu1 %v2933_v46  ;;  %2273 = vmatpush3.bf16.msra.mxu0 %v2933_v46 }
  0x1b   :  { %2258 = vmatprep.subr.bf16.mxu1 %v2795_v1  ;;  %2286 = vmatprep.subr.bf16.mxu0 %v2795_v1 }
  0xca   :  { %v294_v8 = vpop.f32.mrf.mxu1  ;;  %v2880_v9 = vpop.f32.mrf.mxu0 }
  0xcb   :  { %v178_v6 = vadd.f32 %v2880_v9, %v2885_v10 }
  0xcc   :  { %v2244_v11 = vpop.f32.mrf.mxu1  ;;  %v169_v12 = vpop.f32.mrf.mxu0 }
  0xcd   :  { %v170_v13 = vadd.f32 %v2885_v10, %v169_v12 }
  0xce   :  { %v297_v14 = vpop.f32.mrf.mxu1  ;;  %v2888_v15 = vpop.f32.mrf.mxu0 }
  0xcf   :  { %v301_v16 = vadd.f32 %v294_v8, %v170_v13  ;;  %v181_v12 = vadd.f32 %v2888_v15, %v2885_v10 }
  0xd0   :  { %v2245_v17 = vpop.f32.mrf.mxu1  ;;  %v172_v18 = vpop.f32.mrf.mxu0 }
  0xd1   :  { %2505 = vtanh.f32 %v301_v16  ;;  %v173_v19 = vadd.f32 %v2885_v10, %v172_v18  ;;  %v2085_v23 = vmul.f32 -1.442695, %v301_v16 }
  0xd3   :  { %v302_v20 = vadd.f32 %v297_v14, %v173_v19 }
  0xd5   :  { %2507 = vtanh.f32 %v302_v20  ;;  %v2086_v24 = vmul.f32 -1.442695, %v302_v20 }
  0xd6   :  { %2509 = vpow2.f32 %v2085_v23 }
  0xd7   :  { %2511 = vpow2.f32 %v2086_v24 }
  0xde   :  { %v2506_v21 = vpop.eup %2505 }
  0xdf   :  { %321 = vrot.lane.b32.xlu0 %v2506_v21, %s2798_s18 }
  0xe2   :  { %v2508_v22 = vpop.eup %2507 }
  0xe3   :  { %323 = vrot.lane.b32.xlu0 %v2508_v22, %s2798_s18  ;;  %v2510_v25 = vpop.eup %2509 }
  0xe4   :  { %v309_v26 = vadd.f32 1.0, %v2510_v25  ;;  %v2512_v27 = vpop.eup %2511 }
  0xe5   :  { %v310_v28 = vadd.f32 1.0, %v2512_v27 }
  0xe6   :  { %2513 = vrcp.f32 %v309_v26 }
  0xe7   :  { %2515 = vrcp.f32 %v310_v28 }
  0xf3   :  { %v2514_v29 = vpop.eup %2513 }
  0xf4   :  { %v2516_v32 = vpop.eup %2515  ;;  %v317_v35 = vmul.f32 0.0, %v2514_v29 }
  0xf5   :  { %v318_v38 = vmul.f32 0.0, %v2516_v32 }
 0x151   :  { %v322_v30 = vpop.permute.xlu0 %321 }
 0x152   :  { %v327_v31 = vmul.f32 %v2514_v29, %v322_v30 }
 0x154   :  { %331 = vrot.lane.b32.xlu1 %v327_v31, %s2799_s19 }
 0x155   :  { %v324_v33 = vpop.permute.xlu0 %323 }
 0x156   :  { %v328_v34 = vmul.f32 %v2516_v32, %v324_v33 }
 0x158   :  { %333 = vrot.lane.b32.xlu1 %v328_v34, %s2799_s19 }
 0x1c6   :  { %v332_v36 = vpop.permute.xlu1 %331 }
 0x1c7   :  { %v2895_v37 = vadd.f32 %v332_v36, %v317_v35 }
 0x1c9   :  { %2517 = vtanh.f32 %v2895_v37 }
 0x1ca   :  { %v334_v39 = vpop.permute.xlu1 %333 }
 0x1cb   :  { %v2898_v40 = vadd.f32 %v334_v39, %v318_v38 }
 0x1cd   :  { %2519 = vtanh.f32 %v2898_v40 }
 0x1d6   :  { %v2518_v43 = vpop.eup %2517 }
 0x1d7   :  { %343 = vrot.lane.b32.xlu0 %v2518_v43, %s2798_s18 }
 0x1da   :  { %v2520_v45 = vpop.eup %2519 }
 0x1db   :  { %345 = vrot.lane.b32.xlu1 %v2520_v45, %s2798_s18 }
 0x249   :  { %v344_v47 = vpop.permute.xlu0 %343 }
 0x24a   :  { %v349_v49 = vmul.f32 %v2514_v29, %v344_v47 }
 0x24d   :  { %v346_v48 = vpop.permute.xlu1 %345 }
 0x24e   :  { %v350_v50 = vmul.f32 %v2516_v32, %v346_v48 }
 0x250   :  { %v2412_v51 = vpack.i.bf16 %v350_v50, %v349_v49  ;;  %v485_v52 = vpack.c.bf16 %v350_v50, %v349_v49 }
 0x252   :  { %2413 = vrot.lane.b32.xlu0 %v2412_v51, %s2799_s19  ;;  %487 = vrot.lane.b32.xlu1 %v485_v52, %s2799_s19 }
 0x2c4   :  { %v2414_v53 = vpop.permute.xlu0 %2413  ;;  %v488_v59 = vpop.permute.xlu1 %487 }
 0x2c5   :  { %v2416_v54 = vunpack.i.h.bf16 %v2414_v53  ;;  %v2415_v55 = vunpack.i.l.bf16 %v2414_v53 }
 0x2c7   :  { %v360_v56 = vsel %vm110_vm1, %v2416_v54, 0.0  ;;  %v359_v57 = vsel %vm110_vm1, %v2415_v55, 0.0 }
 0x2c8   :  { %v361_v58 = vpack.c.bf16 %v360_v56, %v359_v57 }
 0x2ca   :  { %2255 = vmatmul.mubr.msk.bf16.vlgmr.msra.gmra.mxu1 %vm392_vm2, %v361_v58 }
 0x2cb   :  { %2259 = vmatpush3.bf16.msra.mxu1 %v2853_v2  ;;  %2262 = vmatprep.mubr.msk.bf16.mxu1 %vm2796_vm0, %v2795_v1 }
 0x2cc   :  { %2260 = vmatprep.subr.bf16.mxu1 %v2795_v1 }
 0x2cf   :  { %2261 = vmatpush3.bf16.msra.mxu1 %v2864_v4 }
 0x2d0   :  { %2278 = vmatprep.subr.bf16.mxu1 %v2795_v1 }
 0x2d2   :  { %2263 = vmatmul.mubr.msk.bf16.vlgmr.msra.gmra.mxu1 %vm110_vm1, %v488_v59 }
 0x2d3   :  { %2279 = vmatpush3.bf16.msra.mxu1 %v2853_v2  ;;  %2282 = vmatprep.mubr.msk.bf16.mxu1 %vm2796_vm0, %v2795_v1 }
 0x2d4   :  { %2280 = vmatprep.subr.bf16.mxu1 %v2795_v1 }
 0x2d7   :  { %2281 = vmatpush3.bf16.msra.mxu1 %v2864_v4 }
 0x2d8   :  { %2298 = vmatprep.subr.bf16.mxu1 %v2795_v1 }
 0x38a   :  { %v430_v61 = vpop.f32.mrf.mxu1 }
 0x38b   :  { %v431_v62 = vadd.f32 %v2960_v60, %v430_v61 }
 0x38c   :  { %v2256_v63 = vpop.f32.mrf.mxu1 }
 0x38d   :  { %2521 = vtanh.f32 %v431_v62  ;;  %v2093_v20 = vmul.f32 -1.442695, %v431_v62 }
 0x38e   :  { %v433_v0 = vpop.f32.mrf.mxu1 }
 0x38f   :  { %v434_v3 = vadd.f32 %v2960_v60, %v433_v0 }
 0x390   :  { %v2257_v5 = vpop.f32.mrf.mxu1 }
 0x391   :  { %2523 = vtanh.f32 %v434_v3  ;;  %v2094_v15 = vmul.f32 -1.442695, %v434_v3  ;;  %v2499_v3 = vld [vmem:[%s3443_s0 + $0x20] sm:$0xff]  }
 0x392   :  { %v526_v7 = vpop.f32.mrf.mxu1 }
 0x393   :  { %v533_v8 = vadd.f32 %v526_v7, %v178_v6  ;;  %v2500_v6 = vld [vmem:[%s3443_s0 + $0x28] sm:$0xff]   ;;  %v2501_v7 = vld [vmem:[%s3443_s0 + $0x30] sm:$0xff]  }
 0x394   :  { %v2264_v11 = vpop.f32.mrf.mxu1 }
 0x395   :  { %2525 = vtanh.f32 %v533_v8  ;;  %v2096_v21 = vmul.f32 -1.442695, %v533_v8  ;;  %v2502_v8 = vld [vmem:[%s3443_s0 + $0x38] sm:$0xff]  }
 0x396   :  { %v529_v13 = vpop.f32.mrf.mxu1 }
 0x397   :  { %v534_v14 = vadd.f32 %v529_v13, %v181_v12 }
 0x398   :  { %v2265_v16 = vpop.f32.mrf.mxu1 }
 0x399   :  { %2527 = vtanh.f32 %v534_v14  ;;  %v2097_v22 = vmul.f32 -1.442695, %v534_v14 }
 0x39a   :  { %v2522_v17 = vpop.eup %2521  ;;  %2529 = vpow2.f32 %v2093_v20 }
 0x39b   :  { %455 = vrot.lane.b32.xlu0 %v2522_v17, %s2798_s18  ;;  %2531 = vpow2.f32 %v2094_v15 }
 0x39c   :  { %2533 = vpow2.f32 %v2096_v21 }
 0x39d   :  { %2535 = vpow2.f32 %v2097_v22 }
 0x39e   :  { %v2524_v18 = vpop.eup %2523 }
 0x39f   :  { %457 = vrot.lane.b32.xlu1 %v2524_v18, %s2798_s18 }
 0x3a2   :  { %v2526_v19 = vpop.eup %2525 }
 0x3a3   :  { %553 = vrot.lane.b32.xlu0 %v2526_v19, %s2798_s18 }
 0x3a6   :  { %v2528_v9 = vpop.eup %2527 }
 0x3a7   :  { %555 = vrot.lane.b32.xlu1 %v2528_v9, %s2798_s18  ;;  %v2530_v23 = vpop.eup %2529 }
 0x3a8   :  { %v443_v24 = vadd.f32 1.0, %v2530_v23  ;;  %v2532_v25 = vpop.eup %2531 }
 0x3a9   :  { %v444_v26 = vadd.f32 1.0, %v2532_v25  ;;  %v2534_v27 = vpop.eup %2533 }
 0x3aa   :  { %2537 = vrcp.f32 %v443_v24  ;;  %v541_v28 = vadd.f32 1.0, %v2534_v27  ;;  %v2536_v29 = vpop.eup %2535 }
 0x3ab   :  { %2539 = vrcp.f32 %v444_v26  ;;  %v542_v30 = vadd.f32 1.0, %v2536_v29 }
 0x3ac   :  { %2541 = vrcp.f32 %v541_v28 }
 0x3ad   :  { %2543 = vrcp.f32 %v542_v30 }
 0x3b7   :  { %v2538_v31 = vpop.eup %2537 }
 0x3b8   :  { %v2540_v34 = vpop.eup %2539  ;;  %v451_v49 = vmul.f32 0.0, %v2538_v31 }
 0x3b9   :  { %v2542_v38 = vpop.eup %2541  ;;  %v452_v52 = vmul.f32 0.0, %v2540_v34 }
 0x3ba   :  { %v2544_v45 = vpop.eup %2543  ;;  %v549_v55 = vmul.f32 %v2542_v38, %v2895_v37  ;;  %v2497_v37 = vld [vmem:[%s3443_s0 + $0x10] sm:$0xff]  }
 0x3bb   :  { %v550_v58 = vmul.f32 %v2544_v45, %v2898_v40  ;;  %v2498_v40 = vld [vmem:[%s3443_s0 + $0x18] sm:$0xff]   ;;  %2226 = vmatprep.mubr.msk.bf16.mxu0 %vm110_vm1, %v2497_v37 }
 0x3bc   :  { %2227 = vmatmul.mubr.msk.bf16.gmra.mxu0 %vm110_vm1, %v2498_v40 }
 0x3bd   :  { %2230 = vmatprep.mubr.msk.bf16.mxu0 %vm110_vm1, %v2499_v3 }
 0x3c4   :  { %2231 = vmatmul.mubr.msk.bf16.gmra.mxu0 %vm110_vm1, %v2500_v6 }
 0x3c5   :  { %2234 = vmatprep.mubr.msk.bf16.mxu0 %vm110_vm1, %v2501_v7 }
 0x3cc   :  { %2235 = vmatmul.mubr.msk.bf16.gmra.mxu0 %vm110_vm1, %v2502_v8 }
 0x3cd   :  { %2274 = vmatprep.mubr.msk.bf16.mxu0 %vm2796_vm0, %v2795_v1 }
 0x40d   :  { %v456_v32 = vpop.permute.xlu0 %455 }
 0x40e   :  { %v461_v33 = vmul.f32 %v2538_v31, %v456_v32 }
 0x410   :  { %465 = vrot.lane.b32.xlu0 %v461_v33, %s2799_s19 }
 0x411   :  { %v458_v35 = vpop.permute.xlu1 %457 }
 0x412   :  { %v462_v36 = vmul.f32 %v2540_v34, %v458_v35 }
 0x414   :  { %467 = vrot.lane.b32.xlu1 %v462_v36, %s2799_s19 }
 0x415   :  { %v554_v39 = vpop.permute.xlu0 %553 }
 0x416   :  { %v559_v43 = vmul.f32 %v2542_v38, %v554_v39 }
 0x418   :  { %563 = vrot.lane.b32.xlu0 %v559_v43, %s2799_s19 }
 0x419   :  { %v556_v47 = vpop.permute.xlu1 %555 }
 0x41a   :  { %v560_v48 = vmul.f32 %v2544_v45, %v556_v47 }
 0x41c   :  { %565 = vrot.lane.b32.xlu1 %v560_v48, %s2799_s19 }
 0x482   :  { %v466_v50 = vpop.permute.xlu0 %465 }
 0x483   :  { %v2976_v51 = vadd.f32 %v466_v50, %v451_v49 }
 0x485   :  { %2545 = vtanh.f32 %v2976_v51 }
 0x486   :  { %v468_v53 = vpop.permute.xlu1 %467 }
 0x487   :  { %v2979_v54 = vadd.f32 %v468_v53, %v452_v52 }
 0x489   :  { %2547 = vtanh.f32 %v2979_v54 }
 0x48a   :  { %v564_v56 = vpop.permute.xlu0 %563 }
 0x48b   :  { %v2983_v57 = vadd.f32 %v564_v56, %v549_v55 }
 0x48d   :  { %2549 = vtanh.f32 %v2983_v57 }
 0x48e   :  { %v566_v59 = vpop.permute.xlu1 %565 }
 0x48f   :  { %v2987_v61 = vadd.f32 %v566_v59, %v550_v58 }
 0x491   :  { %2551 = vtanh.f32 %v2987_v61 }
 0x492   :  { %v2546_v62 = vpop.eup %2545 }
 0x493   :  { %477 = vrot.lane.b32.xlu0 %v2546_v62, %s2798_s18 }
 0x496   :  { %v2548_v63 = vpop.eup %2547 }
 0x497   :  { %479 = vrot.lane.b32.xlu1 %v2548_v63, %s2798_s18 }
 0x49a   :  { %v2550_v0 = vpop.eup %2549 }
 0x49b   :  { %575 = vrot.lane.b32.xlu0 %v2550_v0, %s2798_s18 }
 0x49e   :  { %v2552_v5 = vpop.eup %2551 }
 0x49f   :  { %577 = vrot.lane.b32.xlu1 %v2552_v5, %s2798_s18 }
 0x505   :  { %v478_v11 = vpop.permute.xlu0 %477 }
 0x506   :  { %v483_v13 = vmul.f32 %v2538_v31, %v478_v11  ;;  %v3043_v31 = vpop.f32.mrf.mxu0 }
 0x508   :  { %v185_v32 = vpop.f32.mrf.mxu0 }
 0x509   :  { %v480_v12 = vpop.permute.xlu1 %479  ;;  %v186_v50 = vadd.f32 %v2885_v10, %v185_v32 }
 0x50a   :  { %v484_v14 = vmul.f32 %v2540_v34, %v480_v12  ;;  %v3045_v33 = vpop.f32.mrf.mxu0 }
 0x50c   :  { %v2417_v16 = vpack.i.bf16 %v484_v14, %v483_v13  ;;  %v188_v34 = vpop.f32.mrf.mxu0 }
 0x50d   :  { %v576_v17 = vpop.permute.xlu0 %575  ;;  %v189_v63 = vadd.f32 %v2885_v10, %v188_v34 }
 0x50e   :  { %2418 = vrot.lane.b32.xlu1 %v2417_v16, %s2798_s18  ;;  %v581_v19 = vmul.f32 %v2542_v38, %v576_v17  ;;  %v3047_v35 = vpop.f32.mrf.mxu0 }
 0x510   :  { %v3049_v36 = vpop.f32.mrf.mxu0 }
 0x511   :  { %v578_v18 = vpop.permute.xlu1 %577 }
 0x512   :  { %v582_v9 = vmul.f32 %v2544_v45, %v578_v18  ;;  %v3051_v38 = vpop.f32.mrf.mxu0 }
 0x514   :  { %v2422_v20 = vpack.i.bf16 %v582_v9, %v581_v19  ;;  %v694_v15 = vpack.c.bf16 %v582_v9, %v581_v19  ;;  %v3053_v39 = vpop.f32.mrf.mxu0 }
 0x516   :  { %2423 = vrot.lane.b32.xlu0 %v2422_v20, %s2799_s19  ;;  %v3055_v43 = vpop.f32.mrf.mxu0 }
 0x518   :  { %v3057_v45 = vpop.f32.mrf.mxu0 }
 0x51a   :  { %696 = vrot.lane.b32.xlu0 %v694_v15, %s2799_s19  ;;  %v3059_v47 = vpop.f32.mrf.mxu0 }
 0x51c   :  { %v3061_v48 = vpop.f32.mrf.mxu0 }
 0x580   :  { %v2419_v21 = vpop.permute.xlu1 %2418 }
 0x581   :  { %v2421_v23 = vunpack.i.h.bf16 %v2419_v21  ;;  %v2420_v24 = vunpack.i.l.bf16 %v2419_v21 }
 0x588   :  { %v2424_v22 = vpop.permute.xlu0 %2423 }
 0x589   :  { %v2426_v25 = vunpack.i.h.bf16 %v2424_v22  ;;  %v2425_v26 = vunpack.i.l.bf16 %v2424_v22 }
 0x58b   :  { %v599_v27 = vsel %vm110_vm1, %v2425_v26, %v2420_v24  ;;  %v600_v28 = vsel %vm110_vm1, %v2426_v25, %v2421_v23 }
 0x58c   :  { %v601_v29 = vpack.c.bf16 %v600_v28, %v599_v27  ;;  %v697_v30 = vpop.permute.xlu0 %696 }
 0x58d   :  { %2283 = vmatmul.mubr.msk.bf16.vlgmr.msra.gmra.mxu1 %vm110_vm1, %v697_v30 }
 0x58e   :  { %2275 = vmatmul.mubr.msk.bf16.vlgmr.msra.gmra.mxu0 %vm392_vm2, %v601_v29  ;;  %2299 = vmatpush3.bf16.msra.mxu1 %v2853_v2 }
 0x58f   :  { %2287 = vmatpush3.bf16.msra.mxu0 %v2904_v41  ;;  %2300 = vmatprep.subr.bf16.mxu1 %v2795_v1 }
 0x590   :  { %2288 = vmatprep.subr.bf16.mxu0 %v2795_v1  ;;  %2302 = vmatprep.mubr.msk.bf16.mxu1 %vm2796_vm0, %v2795_v1 }
 0x591   :  { %2294 = vmatprep.mubr.msk.bf16.mxu0 %vm2796_vm0, %v2795_v1 }
 0x592   :  { %2301 = vmatpush3.bf16.msra.mxu1 %v2864_v4 }
 0x593   :  { %2289 = vmatpush3.bf16.msra.mxu0 %v2910_v42  ;;  %2306 = vmatprep.subr.bf16.mxu1 %v2795_v1 }
 0x594   :  { %2290 = vmatprep.subr.bf16.mxu0 %v2795_v1 }
 0x597   :  { %2291 = vmatpush3.bf16.msra.mxu0 %v2920_v44 }
 0x598   :  { %2292 = vmatprep.subr.bf16.mxu0 %v2795_v1 }
 0x59b   :  { %2293 = vmatpush3.bf16.msra.mxu0 %v2933_v46 }
 0x59c   :  { %2318 = vmatprep.subr.bf16.mxu0 %v2795_v1 }
 0x64d   :  { %v735_v49 = vpop.f32.mrf.mxu1 }
 0x64e   :  { %v639_v52 = vpop.f32.mrf.mxu0  ;;  %v742_v56 = vadd.f32 %v735_v49, %v186_v50 }
 0x64f   :  { %v640_v53 = vadd.f32 %v2960_v60, %v639_v52  ;;  %v2284_v55 = vpop.f32.mrf.mxu1 }
 0x650   :  { %v2276_v58 = vpop.f32.mrf.mxu0  ;;  %v2102_v12 = vmul.f32 -1.442695, %v742_v56 }
 0x651   :  { %2553 = vtanh.f32 %v640_v53  ;;  %v738_v59 = vpop.f32.mrf.mxu1  ;;  %v2099_v11 = vmul.f32 -1.442695, %v640_v53 }
 0x652   :  { %v642_v62 = vpop.f32.mrf.mxu0  ;;  %2555 = vtanh.f32 %v742_v56  ;;  %v743_v3 = vadd.f32 %v738_v59, %v189_v63 }
 0x653   :  { %v643_v0 = vadd.f32 %v2960_v60, %v642_v62  ;;  %v2285_v37 = vpop.f32.mrf.mxu1 }
 0x654   :  { %v2277_v40 = vpop.f32.mrf.mxu0  ;;  %v2103_v14 = vmul.f32 -1.442695, %v743_v3 }
 0x655   :  { %2557 = vtanh.f32 %v643_v0  ;;  %v2100_v13 = vmul.f32 -1.442695, %v643_v0 }
 0x656   :  { %2559 = vtanh.f32 %v743_v3 }
 0x657   :  { %2561 = vpow2.f32 %v2099_v11 }
 0x658   :  { %2563 = vpow2.f32 %v2102_v12 }
 0x659   :  { %2565 = vpow2.f32 %v2100_v13 }
 0x65a   :  { %2567 = vpow2.f32 %v2103_v14 }
 0x65e   :  { %v2554_v5 = vpop.eup %2553 }
 0x65f   :  { %664 = vrot.lane.b32.xlu1 %v2554_v5, %s2798_s18  ;;  %v2556_v6 = vpop.eup %2555 }
 0x662   :  { %v2558_v7 = vpop.eup %2557 }
 0x663   :  { %762 = vrot.lane.b32.xlu1 %v2556_v6, %s2798_s18  ;;  %666 = vrot.lane.b32.xlu0 %v2558_v7, %s2798_s18  ;;  %v2560_v8 = vpop.eup %2559 }
 0x664   :  { %v2562_v16 = vpop.eup %2561 }
 0x665   :  { %v2564_v17 = vpop.eup %2563  ;;  %v652_v18 = vadd.f32 1.0, %v2562_v16 }
 0x666   :  { %v2566_v19 = vpop.eup %2565  ;;  %v750_v9 = vadd.f32 1.0, %v2564_v17 }
 0x667   :  { %764 = vrot.lane.b32.xlu0 %v2560_v8, %s2798_s18  ;;  %2569 = vrcp.f32 %v652_v18  ;;  %v653_v20 = vadd.f32 1.0, %v2566_v19  ;;  %v2568_v15 = vpop.eup %2567 }
 0x668   :  { %2571 = vrcp.f32 %v750_v9  ;;  %v751_v21 = vadd.f32 1.0, %v2568_v15 }
 0x669   :  { %2573 = vrcp.f32 %v653_v20 }
 0x66a   :  { %2575 = vrcp.f32 %v751_v21 }
 0x674   :  { %v2570_v22 = vpop.eup %2569 }
 0x675   :  { %v2572_v25 = vpop.eup %2571  ;;  %v660_v50 = vmul.f32 %v2570_v22, %v2976_v51 }
 0x676   :  { %v2574_v26 = vpop.eup %2573  ;;  %v758_v55 = vmul.f32 %v2572_v25, %v2983_v57 }
 0x677   :  { %v2576_v32 = vpop.eup %2575  ;;  %v661_v56 = vmul.f32 %v2574_v26, %v2979_v54 }
 0x678   :  { %v759_v0 = vmul.f32 %v2576_v32, %v2987_v61 }
 0x6d1   :  { %v665_v23 = vpop.permute.xlu1 %664 }
 0x6d2   :  { %v670_v24 = vmul.f32 %v2570_v22, %v665_v23 }
 0x6d4   :  { %674 = vrot.lane.b32.xlu1 %v670_v24, %s2799_s19 }
 0x6d5   :  { %v763_v27 = vpop.permute.xlu1 %762  ;;  %v667_v28 = vpop.permute.xlu0 %666 }
 0x6d6   :  { %v768_v29 = vmul.f32 %v2572_v25, %v763_v27  ;;  %v671_v30 = vmul.f32 %v2574_v26, %v667_v28 }
 0x6d8   :  { %772 = vrot.lane.b32.xlu1 %v768_v29, %s2799_s19  ;;  %676 = vrot.lane.b32.xlu0 %v671_v30, %s2799_s19 }
 0x6d9   :  { %v765_v34 = vpop.permute.xlu0 %764 }
 0x6da   :  { %v769_v49 = vmul.f32 %v2576_v32, %v765_v34 }
 0x6dc   :  { %774 = vrot.lane.b32.xlu0 %v769_v49, %s2799_s19  ;;  %v197_v49 = vadd.f32 %v3045_v33, %v2885_v10 }
 0x746   :  { %v675_v52 = vpop.permute.xlu1 %674 }
 0x747   :  { %v3076_v53 = vadd.f32 %v675_v52, %v660_v50 }
 0x749   :  { %2577 = vtanh.f32 %v3076_v53 }
 0x74a   :  { %v773_v58 = vpop.permute.xlu1 %772  ;;  %v677_v59 = vpop.permute.xlu0 %676 }
 0x74b   :  { %v3081_v62 = vadd.f32 %v773_v58, %v758_v55  ;;  %v3083_v63 = vadd.f32 %v677_v59, %v661_v56 }
 0x74d   :  { %2579 = vtanh.f32 %v3081_v62 }
 0x74e   :  { %2581 = vtanh.f32 %v3083_v63  ;;  %v775_v51 = vpop.permute.xlu0 %774 }
 0x74f   :  { %v3088_v37 = vadd.f32 %v775_v51, %v759_v0 }
 0x751   :  { %2583 = vtanh.f32 %v3088_v37 }
 0x756   :  { %v2578_v57 = vpop.eup %2577 }
 0x757   :  { %686 = vrot.lane.b32.xlu1 %v2578_v57, %s2798_s18 }
 0x75a   :  { %v2580_v54 = vpop.eup %2579 }
 0x75b   :  { %v2582_v40 = vpop.eup %2581  ;;  %784 = vrot.lane.b32.xlu1 %v2580_v54, %s2798_s18 }
 0x75c   :  { %688 = vrot.lane.b32.xlu0 %v2582_v40, %s2798_s18 }
 0x75e   :  { %v2584_v3 = vpop.eup %2583 }
 0x760   :  { %786 = vrot.lane.b32.xlu0 %v2584_v3, %s2798_s18 }
 0x7c9   :  { %v687_v61 = vpop.permute.xlu1 %686 }
 0x7ca   :  { %v692_v6 = vmul.f32 %v2570_v22, %v687_v61 }
 0x7cd   :  { %v785_v8 = vpop.permute.xlu1 %784 }
 0x7ce   :  { %v689_v5 = vpop.permute.xlu0 %688  ;;  %v790_v13 = vmul.f32 %v2572_v25, %v785_v8 }
 0x7cf   :  { %v693_v7 = vmul.f32 %v2574_v26, %v689_v5  ;;  %v194_v26 = vadd.f32 %v3043_v31, %v2885_v10 }
 0x7d1   :  { %v2432_v11 = vpack.i.bf16 %v693_v7, %v692_v6 }
 0x7d2   :  { %v787_v12 = vpop.permute.xlu0 %786 }
 0x7d3   :  { %v791_v14 = vmul.f32 %v2576_v32, %v787_v12  ;;  %2433 = vrot.lane.b32.xlu0 %v2432_v11, %s2798_s18 }
 0x7d5   :  { %v2427_v16 = vpack.i.bf16 %v791_v14, %v790_v13  ;;  %v903_v17 = vpack.c.bf16 %v791_v14, %v790_v13 }
 0x7d7   :  { %2428 = vrot.lane.b32.xlu1 %v2427_v16, %s2799_s19 }
 0x7db   :  { %905 = vrot.lane.b32.xlu1 %v903_v17, %s2799_s19 }
 0x845   :  { %v2434_v18 = vpop.permute.xlu0 %2433 }
 0x846   :  { %v2436_v9 = vunpack.i.h.bf16 %v2434_v18  ;;  %v2435_v20 = vunpack.i.l.bf16 %v2434_v18 }
 0x849   :  { %v2429_v19 = vpop.permute.xlu1 %2428 }
 0x84a   :  { %v2431_v15 = vunpack.i.h.bf16 %v2429_v19  ;;  %v2430_v21 = vunpack.i.l.bf16 %v2429_v19 }
 0x84c   :  { %v808_v22 = vsel %vm110_vm1, %v2430_v21, %v2435_v20  ;;  %v809_v23 = vsel %vm110_vm1, %v2431_v15, %v2436_v9 }
 0x84d   :  { %v810_v24 = vpack.c.bf16 %v809_v23, %v808_v22  ;;  %v906_v25 = vpop.permute.xlu1 %905 }
 0x84e   :  { %2303 = vmatmul.mubr.msk.bf16.vlgmr.msra.gmra.mxu1 %vm110_vm1, %v906_v25 }
 0x84f   :  { %2295 = vmatmul.mubr.msk.bf16.vlgmr.msra.gmra.mxu0 %vm392_vm2, %v810_v24  ;;  %2307 = vmatpush3.bf16.msra.mxu1 %v2904_v41 }
 0x850   :  { %2308 = vmatprep.subr.bf16.mxu1 %v2795_v1  ;;  %2319 = vmatpush3.bf16.msra.mxu0 %v2853_v2 }
 0x851   :  { %2320 = vmatprep.subr.bf16.mxu0 %v2795_v1  ;;  %2322 = vmatprep.mubr.msk.bf16.mxu0 %vm2796_vm0, %v2795_v1 }
 0x852   :  { %2314 = vmatprep.mubr.msk.bf16.mxu1 %vm2796_vm0, %v2795_v1 }
 0x853   :  { %2309 = vmatpush3.bf16.msra.mxu1 %v2910_v42 }
 0x854   :  { %2310 = vmatprep.subr.bf16.mxu1 %v2795_v1  ;;  %2321 = vmatpush3.bf16.msra.mxu0 %v2864_v4 }
 0x855   :  { %2326 = vmatprep.subr.bf16.mxu0 %v2795_v1 }
 0x857   :  { %2311 = vmatpush3.bf16.msra.mxu1 %v2920_v44 }
 0x858   :  { %2312 = vmatprep.subr.bf16.mxu1 %v2795_v1 }
 0x85b   :  { %2313 = vmatpush3.bf16.msra.mxu1 %v2933_v46 }
 0x85c   :  { %2338 = vmatprep.subr.bf16.mxu1 %v2795_v1 }
 0x90e   :  { %v944_v2 = vpop.f32.mrf.mxu1 }
 0x90f   :  { %v848_v27 = vpop.f32.mrf.mxu0  ;;  %v951_v30 = vadd.f32 %v944_v2, %v194_v26 }
 0x910   :  { %v849_v28 = vadd.f32 %v2960_v60, %v848_v27  ;;  %v2304_v29 = vpop.f32.mrf.mxu1 }
 0x911   :  { %v2296_v4 = vpop.f32.mrf.mxu0  ;;  %v2108_v51 = vmul.f32 -1.442695, %v951_v30 }
 0x912   :  { %2585 = vtanh.f32 %v849_v28  ;;  %v947_v32 = vpop.f32.mrf.mxu1  ;;  %v2105_v33 = vmul.f32 -1.442695, %v849_v28 }
 0x913   :  { %v851_v34 = vpop.f32.mrf.mxu0  ;;  %2587 = vtanh.f32 %v951_v30  ;;  %v952_v56 = vadd.f32 %v947_v32, %v197_v49 }
 0x914   :  { %v852_v50 = vadd.f32 %v2960_v60, %v851_v34  ;;  %v2305_v52 = vpop.f32.mrf.mxu1 }
 0x915   :  { %v2297_v55 = vpop.f32.mrf.mxu0  ;;  %v2109_v54 = vmul.f32 -1.442695, %v952_v56 }
 0x916   :  { %2589 = vtanh.f32 %v852_v50  ;;  %v2106_v57 = vmul.f32 -1.442695, %v852_v50 }
 0x917   :  { %2591 = vtanh.f32 %v952_v56 }
 0x918   :  { %2593 = vpow2.f32 %v2105_v33 }
 0x919   :  { %2595 = vpow2.f32 %v2108_v51 }
 0x91a   :  { %2597 = vpow2.f32 %v2106_v57 }
 0x91b   :  { %2599 = vpow2.f32 %v2109_v54 }
 0x91f   :  { %v2586_v31 = vpop.eup %2585 }
 0x920   :  { %873 = vrot.lane.b32.xlu0 %v2586_v31, %s2798_s18  ;;  %v2588_v58 = vpop.eup %2587 }
 0x923   :  { %v2590_v59 = vpop.eup %2589 }
 0x924   :  { %971 = vrot.lane.b32.xlu0 %v2588_v58, %s2798_s18  ;;  %875 = vrot.lane.b32.xlu1 %v2590_v59, %s2798_s18  ;;  %v2592_v0 = vpop.eup %2591 }
 0x925   :  { %v2594_v40 = vpop.eup %2593 }
 0x926   :  { %v2596_v3 = vpop.eup %2595  ;;  %v861_v61 = vadd.f32 1.0, %v2594_v40 }
 0x927   :  { %v2598_v5 = vpop.eup %2597  ;;  %v959_v6 = vadd.f32 1.0, %v2596_v3 }
 0x928   :  { %973 = vrot.lane.b32.xlu1 %v2592_v0, %s2798_s18  ;;  %2601 = vrcp.f32 %v861_v61  ;;  %v862_v7 = vadd.f32 1.0, %v2598_v5  ;;  %v2600_v8 = vpop.eup %2599 }
 0x929   :  { %2603 = vrcp.f32 %v959_v6  ;;  %v960_v11 = vadd.f32 1.0, %v2600_v8 }
 0x92a   :  { %2605 = vrcp.f32 %v862_v7 }
 0x92b   :  { %2607 = vrcp.f32 %v960_v11 }
 0x935   :  { %v2602_v12 = vpop.eup %2601 }
 0x936   :  { %v2604_v16 = vpop.eup %2603  ;;  %v869_v23 = vmul.f32 %v2602_v12, %v3076_v53 }
 0x937   :  { %v2606_v17 = vpop.eup %2605  ;;  %v967_v2 = vmul.f32 %v2604_v16, %v3081_v62 }
 0x938   :  { %v2608_v15 = vpop.eup %2607  ;;  %v870_v26 = vmul.f32 %v2606_v17, %v3083_v63 }
 0x939   :  { %v968_v4 = vmul.f32 %v2608_v15, %v3088_v37 }
 0x992   :  { %v874_v13 = vpop.permute.xlu0 %873 }
 0x993   :  { %v879_v14 = vmul.f32 %v2602_v12, %v874_v13  ;;  %v202_v13 = vadd.f32 %v2885_v10, %v3049_v36 }
 0x995   :  { %883 = vrot.lane.b32.xlu0 %v879_v14, %s2799_s19 }
 0x996   :  { %v972_v18 = vpop.permute.xlu0 %971  ;;  %v876_v19 = vpop.permute.xlu1 %875 }
 0x997   :  { %v977_v9 = vmul.f32 %v2604_v16, %v972_v18  ;;  %v880_v20 = vmul.f32 %v2606_v17, %v876_v19 }
 0x999   :  { %981 = vrot.lane.b32.xlu0 %v977_v9, %s2799_s19  ;;  %885 = vrot.lane.b32.xlu1 %v880_v20, %s2799_s19 }
 0x99a   :  { %v974_v21 = vpop.permute.xlu1 %973 }
 0x99b   :  { %v978_v22 = vmul.f32 %v2608_v15, %v974_v21 }
 0x99d   :  { %983 = vrot.lane.b32.xlu1 %v978_v22, %s2799_s19 }
 0xa07   :  { %v884_v24 = vpop.permute.xlu0 %883 }
 0xa08   :  { %v3133_v25 = vadd.f32 %v884_v24, %v869_v23 }
 0xa0a   :  { %2609 = vtanh.f32 %v3133_v25 }
 0xa0b   :  { %v982_v27 = vpop.permute.xlu0 %981  ;;  %v886_v28 = vpop.permute.xlu1 %885 }
 0xa0c   :  { %v3138_v29 = vadd.f32 %v982_v27, %v967_v2  ;;  %v3140_v30 = vadd.f32 %v886_v28, %v870_v26 }
 0xa0e   :  { %2611 = vtanh.f32 %v3138_v29 }
 0xa0f   :  { %2613 = vtanh.f32 %v3140_v30  ;;  %v984_v53 = vpop.permute.xlu1 %983 }
 0xa10   :  { %v3145_v32 = vadd.f32 %v984_v53, %v968_v4 }
 0xa12   :  { %2615 = vtanh.f32 %v3145_v32 }
 0xa17   :  { %v2610_v62 = vpop.eup %2609 }
 0xa18   :  { %895 = vrot.lane.b32.xlu0 %v2610_v62, %s2798_s18 }
 0xa1b   :  { %v2612_v63 = vpop.eup %2611 }
 0xa1c   :  { %v2614_v34 = vpop.eup %2613  ;;  %993 = vrot.lane.b32.xlu0 %v2612_v63, %s2798_s18 }
 0xa1d   :  { %897 = vrot.lane.b32.xlu1 %v2614_v34, %s2798_s18 }
 0xa1f   :  { %v2616_v49 = vpop.eup %2615 }
 0xa21   :  { %995 = vrot.lane.b32.xlu1 %v2616_v49, %s2798_s18 }
 0xa8a   :  { %v896_v37 = vpop.permute.xlu0 %895 }
 0xa8b   :  { %v901_v52 = vmul.f32 %v2602_v12, %v896_v37  ;;  %v3164_v12 = vld [vmem:[%s3445_s2 + $0x8] sm:$0xff]  }
 0xa8e   :  { %v994_v56 = vpop.permute.xlu0 %993 }
 0xa8f   :  { %v898_v50 = vpop.permute.xlu1 %897  ;;  %v999_v59 = vmul.f32 %v2604_v16, %v994_v56 }
 0xa90   :  { %v902_v55 = vmul.f32 %v2606_v17, %v898_v50 }
 0xa92   :  { %v2442_v31 = vpack.i.bf16 %v902_v55, %v901_v52 }
 0xa93   :  { %v996_v58 = vpop.permute.xlu1 %995 }
 0xa94   :  { %v1000_v0 = vmul.f32 %v2608_v15, %v996_v58  ;;  %2443 = vrot.lane.b32.xlu1 %v2442_v31, %s2798_s18 }
 0xa96   :  { %v2437_v33 = vpack.i.bf16 %v1000_v0, %v999_v59  ;;  %v1112_v51 = vpack.c.bf16 %v1000_v0, %v999_v59 }
 0xa98   :  { %2438 = vrot.lane.b32.xlu0 %v2437_v33, %s2799_s19 }
 0xa9c   :  { %1114 = vrot.lane.b32.xlu0 %v1112_v51, %s2799_s19 }
 0xb06   :  { %v2444_v57 = vpop.permute.xlu1 %2443 }
 0xb07   :  { %v2446_v40 = vunpack.i.h.bf16 %v2444_v57  ;;  %v2445_v3 = vunpack.i.l.bf16 %v2444_v57 }
 0xb0a   :  { %v2439_v54 = vpop.permute.xlu0 %2438 }
 0xb0b   :  { %v2441_v61 = vunpack.i.h.bf16 %v2439_v54  ;;  %v2440_v5 = vunpack.i.l.bf16 %v2439_v54 }
 0xb0d   :  { %v1017_v6 = vsel %vm110_vm1, %v2440_v5, %v2445_v3  ;;  %v1018_v7 = vsel %vm110_vm1, %v2441_v61, %v2446_v40 }
 0xb0e   :  { %v1019_v8 = vpack.c.bf16 %v1018_v7, %v1017_v6  ;;  %v1115_v11 = vpop.permute.xlu0 %1114 }
 0xb0f   :  { %2323 = vmatmul.mubr.msk.bf16.vlgmr.msra.gmra.mxu0 %vm110_vm1, %v1115_v11 }
 0xb10   :  { %2315 = vmatmul.mubr.msk.bf16.vlgmr.msra.gmra.mxu1 %vm392_vm2, %v1019_v8  ;;  %2327 = vmatpush3.bf16.msra.mxu0 %v2904_v41  ;;  %v3177_v41 = vld [vmem:[%s3445_s2] sm:$0xff]  }
 0xb11   :  { %2328 = vmatprep.subr.bf16.mxu0 %v2795_v1  ;;  %2339 = vmatpush3.bf16.msra.mxu1 %v3164_v12 }
 0xb12   :  { %2340 = vmatprep.subr.bf16.mxu1 %v2795_v1  ;;  %2342 = vmatprep.mubr.msk.bf16.mxu1 %vm2796_vm0, %v2795_v1 }
 0xb13   :  { %2334 = vmatprep.mubr.msk.bf16.mxu0 %vm2796_vm0, %v2795_v1 }
 0xb14   :  { %2329 = vmatpush3.bf16.msra.mxu0 %v2910_v42 }
 0xb15   :  { %2330 = vmatprep.subr.bf16.mxu0 %v2795_v1  ;;  %2341 = vmatpush3.bf16.msra.mxu1 %v3177_v41 }
 0xb16   :  { %2346 = vmatprep.subr.bf16.mxu1 %v2795_v1 }
 0xb18   :  { %2331 = vmatpush3.bf16.msra.mxu0 %v2920_v44  ;;  %v205_v44 = vadd.f32 %v2885_v10, %v3053_v39 }
 0xb19   :  { %2332 = vmatprep.subr.bf16.mxu0 %v2795_v1 }
 0xb1c   :  { %2333 = vmatpush3.bf16.msra.mxu0 %v2933_v46 }
 0xb1d   :  { %2358 = vmatprep.subr.bf16.mxu0 %v2795_v1 }
 0xbcf   :  { %v1153_v42 = vpop.f32.mrf.mxu0 }
 0xbd0   :  { %v1057_v14 = vpop.f32.mrf.mxu1  ;;  %v1160_v18 = vadd.f32 %v1153_v42, %v202_v13 }
 0xbd1   :  { %v1058_v16 = vadd.f32 %v2960_v60, %v1057_v14  ;;  %v2324_v17 = vpop.f32.mrf.mxu0 }
 0xbd2   :  { %v2316_v19 = vpop.f32.mrf.mxu1 }
 0xbd3   :  { %2617 = vtanh.f32 %v1058_v16  ;;  %v1156_v9 = vpop.f32.mrf.mxu0  ;;  %v2111_v10 = vmul.f32 -1.442695, %v1058_v16 }
 0xbd4   :  { %v1060_v20 = vpop.f32.mrf.mxu1  ;;  %2619 = vtanh.f32 %v1160_v18  ;;  %v1161_v22 = vadd.f32 %v1156_v9, %v205_v44 }
 0xbd5   :  { %v1061_v46 = vadd.f32 %v2960_v60, %v1060_v20  ;;  %v2325_v15 = vpop.f32.mrf.mxu0  ;;  %v2114_v60 = vmul.f32 -1.442695, %v1160_v18 }
 0xbd6   :  { %v2317_v21 = vpop.f32.mrf.mxu1  ;;  %v2115_v26 = vmul.f32 -1.442695, %v1161_v22 }
 0xbd7   :  { %2621 = vtanh.f32 %v1061_v46  ;;  %v2112_v39 = vmul.f32 -1.442695, %v1061_v46 }
 0xbd8   :  { %2623 = vtanh.f32 %v1161_v22 }
 0xbd9   :  { %2625 = vpow2.f32 %v2111_v10 }
 0xbda   :  { %2627 = vpow2.f32 %v2114_v60 }
 0xbdb   :  { %2629 = vpow2.f32 %v2112_v39 }
 0xbdc   :  { %2631 = vpow2.f32 %v2115_v26 }
 0xbe0   :  { %v2618_v36 = vpop.eup %2617 }
 0xbe1   :  { %1082 = vrot.lane.b32.xlu1 %v2618_v36, %s2798_s18  ;;  %v2620_v23 = vpop.eup %2619 }
 0xbe4   :  { %v2622_v24 = vpop.eup %2621 }
 0xbe5   :  { %1084 = vrot.lane.b32.xlu0 %v2622_v24, %s2798_s18  ;;  %1180 = vrot.lane.b32.xlu1 %v2620_v23, %s2798_s18  ;;  %v2624_v2 = vpop.eup %2623 }
 0xbe6   :  { %v2626_v27 = vpop.eup %2625 }
 0xbe7   :  { %v2628_v28 = vpop.eup %2627  ;;  %v1070_v4 = vadd.f32 1.0, %v2626_v27 }
 0xbe8   :  { %v2630_v53 = vpop.eup %2629  ;;  %v1168_v62 = vadd.f32 1.0, %v2628_v28 }
 0xbe9   :  { %1182 = vrot.lane.b32.xlu0 %v2624_v2, %s2798_s18  ;;  %2633 = vrcp.f32 %v1070_v4  ;;  %v1071_v63 = vadd.f32 1.0, %v2630_v53  ;;  %v2632_v34 = vpop.eup %2631  ;;  %v3229_v4 = vld [vmem:[%s3447_s4 + $0x18] sm:$0xff]   ;;  %v3242_v53 = vld [vmem:[%s3447_s4 + $0x10] sm:$0xff]  }
 0xbea   :  { %2635 = vrcp.f32 %v1168_v62  ;;  %v1169_v49 = vadd.f32 1.0, %v2632_v34  ;;  %v3251_v62 = vld [vmem:[%s3447_s4 + $0x8] sm:$0xff]  }
 0xbeb   :  { %2637 = vrcp.f32 %v1071_v63  ;;  %v3258_v63 = vld [vmem:[%s3447_s4] sm:$0xff]  }
 0xbec   :  { %2639 = vrcp.f32 %v1169_v49  ;;  %v3265_v49 = vld [vmem:[%s3446_s3] ss:$0 sm:$0xff] }
 0xbf6   :  { %v2634_v37 = vpop.eup %2633 }
 0xbf7   :  { %v2636_v55 = vpop.eup %2635  ;;  %v1078_v54 = vmul.f32 %v2634_v37, %v3133_v25 }
 0xbf8   :  { %v2638_v56 = vpop.eup %2637  ;;  %v1176_v61 = vmul.f32 %v2636_v55, %v3138_v29 }
 0xbf9   :  { %v2640_v33 = vpop.eup %2639  ;;  %v1079_v5 = vmul.f32 %v2638_v56, %v3140_v30 }
 0xbfa   :  { %v1177_v42 = vmul.f32 %v2640_v33, %v3145_v32 }
 0xc53   :  { %v1083_v50 = vpop.permute.xlu1 %1082 }
 0xc54   :  { %v1088_v52 = vmul.f32 %v2634_v37, %v1083_v50 }
 0xc56   :  { %1092 = vrot.lane.b32.xlu1 %v1088_v52, %s2799_s19  ;;  %v3272_v52 = vld [vmem:[%s3448_s5] ss:$0 sm:$0xff] }
 0xc57   :  { %v1085_v31 = vpop.permute.xlu0 %1084  ;;  %v1181_v58 = vpop.permute.xlu1 %1180 }
 0xc58   :  { %v1089_v59 = vmul.f32 %v2638_v56, %v1085_v31  ;;  %v1186_v0 = vmul.f32 %v2636_v55, %v1181_v58 }
 0xc5a   :  { %1190 = vrot.lane.b32.xlu1 %v1186_v0, %s2799_s19  ;;  %1094 = vrot.lane.b32.xlu0 %v1089_v59, %s2799_s19 }
 0xc5b   :  { %v1183_v51 = vpop.permute.xlu0 %1182 }
 0xc5c   :  { %v1187_v57 = vmul.f32 %v2640_v33, %v1183_v51 }
 0xc5e   :  { %1192 = vrot.lane.b32.xlu0 %v1187_v57, %s2799_s19 }
 0xcc8   :  { %v1093_v40 = vpop.permute.xlu1 %1092 }
 0xcc9   :  { %v3200_v3 = vadd.f32 %v1093_v40, %v1078_v54 }
 0xccb   :  { %2641 = vtanh.f32 %v3200_v3 }
 0xccc   :  { %v1191_v6 = vpop.permute.xlu1 %1190  ;;  %v1095_v7 = vpop.permute.xlu0 %1094 }
 0xccd   :  { %v3205_v8 = vadd.f32 %v1191_v6, %v1176_v61  ;;  %v3207_v11 = vadd.f32 %v1095_v7, %v1079_v5 }
 0xccf   :  { %2643 = vtanh.f32 %v3205_v8 }
 0xcd0   :  { %2645 = vtanh.f32 %v3207_v11  ;;  %v1193_v25 = vpop.permute.xlu0 %1192 }
 0xcd1   :  { %v3212_v13 = vadd.f32 %v1193_v25, %v1177_v42 }
 0xcd3   :  { %2647 = vtanh.f32 %v3212_v13 }
 0xcd8   :  { %v2642_v29 = vpop.eup %2641 }
 0xcd9   :  { %1104 = vrot.lane.b32.xlu1 %v2642_v29, %s2798_s18 }
 0xcdc   :  { %v2644_v30 = vpop.eup %2643 }
 0xcdd   :  { %v2646_v14 = vpop.eup %2645  ;;  %1202 = vrot.lane.b32.xlu1 %v2644_v30, %s2798_s18 }
 0xcde   :  { %1106 = vrot.lane.b32.xlu0 %v2646_v14, %s2798_s18 }
 0xce0   :  { %v2648_v16 = vpop.eup %2647 }
 0xce2   :  { %1204 = vrot.lane.b32.xlu0 %v2648_v16, %s2798_s18 }
 0xd4b   :  { %v1105_v32 = vpop.permute.xlu1 %1104 }
 0xd4c   :  { %v1110_v18 = vmul.f32 %v2634_v37, %v1105_v32  ;;  %v210_v37 = vadd.f32 %v3265_v49, %v3047_v35 }
 0xd4f   :  { %v1203_v9 = vpop.permute.xlu1 %1202 }
 0xd50   :  { %v1107_v17 = vpop.permute.xlu0 %1106  ;;  %v1208_v46 = vmul.f32 %v2636_v55, %v1203_v9 }
 0xd51   :  { %v1111_v19 = vmul.f32 %v2638_v56, %v1107_v17 }
 0xd53   :  { %v2452_v20 = vpack.i.bf16 %v1111_v19, %v1110_v18 }
 0xd54   :  { %v1205_v44 = vpop.permute.xlu0 %1204 }
 0xd55   :  { %v1209_v15 = vmul.f32 %v2640_v33, %v1205_v44  ;;  %2453 = vrot.lane.b32.xlu0 %v2452_v20, %s2798_s18  ;;  %v213_v33 = vadd.f32 %v3265_v49, %v3051_v38 }
 0xd57   :  { %v2447_v21 = vpack.i.bf16 %v1209_v15, %v1208_v46  ;;  %v1321_v22 = vpack.c.bf16 %v1209_v15, %v1208_v46 }
 0xd59   :  { %2448 = vrot.lane.b32.xlu1 %v2447_v21, %s2799_s19 }
 0xd5d   :  { %1323 = vrot.lane.b32.xlu1 %v1321_v22, %s2799_s19 }
 0xdc7   :  { %v2454_v36 = vpop.permute.xlu0 %2453 }
 0xdc8   :  { %v2456_v24 = vunpack.i.h.bf16 %v2454_v36  ;;  %v2455_v2 = vunpack.i.l.bf16 %v2454_v36 }
 0xdcb   :  { %v2449_v23 = vpop.permute.xlu1 %2448 }
 0xdcc   :  { %v2451_v10 = vunpack.i.h.bf16 %v2449_v23  ;;  %v2450_v60 = vunpack.i.l.bf16 %v2449_v23 }
 0xdce   :  { %v1226_v39 = vsel %vm110_vm1, %v2450_v60, %v2455_v2  ;;  %v1227_v26 = vsel %vm110_vm1, %v2451_v10, %v2456_v24 }
 0xdcf   :  { %v1228_v27 = vpack.c.bf16 %v1227_v26, %v1226_v39  ;;  %v1324_v28 = vpop.permute.xlu1 %1323 }
 0xdd0   :  { %2343 = vmatmul.mubr.msk.bf16.vlgmr.msra.gmra.mxu1 %vm110_vm1, %v1324_v28 }
 0xdd1   :  { %2335 = vmatmul.mubr.msk.bf16.vlgmr.msra.gmra.mxu0 %vm392_vm2, %v1228_v27  ;;  %2347 = vmatpush3.bf16.msra.mxu1 %v3229_v4 }
 0xdd2   :  { %2348 = vmatprep.subr.bf16.mxu1 %v2795_v1  ;;  %2359 = vmatpush3.bf16.msra.mxu0 %v3164_v12 }
 0xdd3   :  { %2360 = vmatprep.subr.bf16.mxu0 %v2795_v1  ;;  %2362 = vmatprep.mubr.msk.bf16.mxu0 %vm2796_vm0, %v2795_v1 }
 0xdd4   :  { %2354 = vmatprep.mubr.msk.bf16.mxu1 %vm2796_vm0, %v2795_v1 }
 0xdd5   :  { %2349 = vmatpush3.bf16.msra.mxu1 %v3242_v53 }
 0xdd6   :  { %2350 = vmatprep.subr.bf16.mxu1 %v2795_v1  ;;  %2361 = vmatpush3.bf16.msra.mxu0 %v3177_v41 }
 0xdd7   :  { %2366 = vmatprep.subr.bf16.mxu0 %v2795_v1 }
 0xdd9   :  { %2351 = vmatpush3.bf16.msra.mxu1 %v3251_v62 }
 0xdda   :  { %2352 = vmatprep.subr.bf16.mxu1 %v2795_v1 }
 0xddd   :  { %2353 = vmatpush3.bf16.msra.mxu1 %v3258_v63 }
 0xdde   :  { %2378 = vmatprep.subr.bf16.mxu1 %v2795_v1 }
 0xe90   :  { %v1362_v34 = vpop.f32.mrf.mxu1 }
 0xe91   :  { %v1266_v50 = vpop.f32.mrf.mxu0  ;;  %v1369_v31 = vadd.f32 %v1362_v34, %v210_v37 }
 0xe92   :  { %v1267_v55 = vadd.f32 %v3272_v52, %v1266_v50  ;;  %v2344_v56 = vpop.f32.mrf.mxu1 }
 0xe93   :  { %v2336_v58 = vpop.f32.mrf.mxu0  ;;  %v2120_v7 = vmul.f32 -1.442695, %v1369_v31 }
 0xe94   :  { %2649 = vtanh.f32 %v1267_v55  ;;  %v1365_v59 = vpop.f32.mrf.mxu1  ;;  %v2117_v38 = vmul.f32 -1.442695, %v1267_v55 }
 0xe95   :  { %v1269_v0 = vpop.f32.mrf.mxu0  ;;  %2651 = vtanh.f32 %v1369_v31  ;;  %v1370_v54 = vadd.f32 %v1365_v59, %v213_v33 }
 0xe96   :  { %v1270_v51 = vadd.f32 %v3272_v52, %v1269_v0  ;;  %v2345_v35 = vpop.f32.mrf.mxu1 }
 0xe97   :  { %v2337_v57 = vpop.f32.mrf.mxu0  ;;  %v2121_v25 = vmul.f32 -1.442695, %v1370_v54 }
 0xe98   :  { %2653 = vtanh.f32 %v1270_v51  ;;  %v2118_v42 = vmul.f32 -1.442695, %v1270_v51 }
 0xe99   :  { %2655 = vtanh.f32 %v1370_v54 }
 0xe9a   :  { %2657 = vpow2.f32 %v2117_v38 }
 0xe9b   :  { %2659 = vpow2.f32 %v2120_v7 }
 0xe9c   :  { %2661 = vpow2.f32 %v2118_v42 }
 0xe9d   :  { %2663 = vpow2.f32 %v2121_v25 }
 0xea1   :  { %v2650_v40 = vpop.eup %2649 }
 0xea2   :  { %1291 = vrot.lane.b32.xlu0 %v2650_v40, %s2798_s18  ;;  %v2652_v61 = vpop.eup %2651 }
 0xea5   :  { %v2654_v5 = vpop.eup %2653 }
 0xea6   :  { %1389 = vrot.lane.b32.xlu0 %v2652_v61, %s2798_s18  ;;  %1293 = vrot.lane.b32.xlu1 %v2654_v5, %s2798_s18  ;;  %v2656_v6 = vpop.eup %2655 }
 0xea7   :  { %v2658_v29 = vpop.eup %2657 }
 0xea8   :  { %v2660_v30 = vpop.eup %2659  ;;  %v1279_v14 = vadd.f32 1.0, %v2658_v29 }
 0xea9   :  { %v2662_v16 = vpop.eup %2661  ;;  %v1377_v32 = vadd.f32 1.0, %v2660_v30 }
 0xeaa   :  { %1391 = vrot.lane.b32.xlu1 %v2656_v6, %s2798_s18  ;;  %2665 = vrcp.f32 %v1279_v14  ;;  %v1280_v17 = vadd.f32 1.0, %v2662_v16  ;;  %v2664_v18 = vpop.eup %2663 }
 0xeab   :  { %2667 = vrcp.f32 %v1377_v32  ;;  %v1378_v19 = vadd.f32 1.0, %v2664_v18  ;;  %v218_v18 = vadd.f32 %v3265_v49, %v3057_v45 }
 0xeac   :  { %2669 = vrcp.f32 %v1280_v17 }
 0xead   :  { %2671 = vrcp.f32 %v1378_v19 }
 0xeb7   :  { %v2666_v9 = vpop.eup %2665 }
 0xeb8   :  { %v2668_v46 = vpop.eup %2667  ;;  %v1287_v60 = vmul.f32 %v2666_v9, %v3200_v3 }
 0xeb9   :  { %v2670_v15 = vpop.eup %2669  ;;  %v1385_v27 = vmul.f32 %v2668_v46, %v3205_v8 }
 0xeba   :  { %v2672_v24 = vpop.eup %2671  ;;  %v1288_v28 = vmul.f32 %v2670_v15, %v3207_v11 }
 0xebb   :  { %v1386_v56 = vmul.f32 %v2672_v24, %v3212_v13 }
 0xf14   :  { %v1292_v20 = vpop.permute.xlu0 %1291 }
 0xf15   :  { %v1297_v44 = vmul.f32 %v2666_v9, %v1292_v20 }
 0xf17   :  { %1301 = vrot.lane.b32.xlu0 %v1297_v44, %s2799_s19 }
 0xf18   :  { %v1390_v21 = vpop.permute.xlu0 %1389  ;;  %v1294_v22 = vpop.permute.xlu1 %1293 }
 0xf19   :  { %v1395_v36 = vmul.f32 %v2668_v46, %v1390_v21  ;;  %v1298_v23 = vmul.f32 %v2670_v15, %v1294_v22  ;;  %v221_v21 = vadd.f32 %v3265_v49, %v3061_v48 }
 0xf1b   :  { %1399 = vrot.lane.b32.xlu0 %v1395_v36, %s2799_s19  ;;  %1303 = vrot.lane.b32.xlu1 %v1298_v23, %s2799_s19 }
 0xf1c   :  { %v1392_v2 = vpop.permute.xlu1 %1391 }
 0xf1d   :  { %v1396_v10 = vmul.f32 %v2672_v24, %v1392_v2 }
 0xf1f   :  { %1401 = vrot.lane.b32.xlu1 %v1396_v10, %s2799_s19 }
 0xf89   :  { %v1302_v39 = vpop.permute.xlu0 %1301 }
 0xf8a   :  { %v3287_v26 = vadd.f32 %v1302_v39, %v1287_v60 }
 0xf8c   :  { %2673 = vtanh.f32 %v3287_v26 }
 0xf8d   :  { %v1400_v34 = vpop.permute.xlu0 %1399  ;;  %v1304_v37 = vpop.permute.xlu1 %1303 }
 0xf8e   :  { %v3292_v50 = vadd.f32 %v1400_v34, %v1385_v27  ;;  %v3294_v55 = vadd.f32 %v1304_v37, %v1288_v28 }
 0xf90   :  { %2675 = vtanh.f32 %v3292_v50 }
 0xf91   :  { %2677 = vtanh.f32 %v3294_v55  ;;  %v1402_v3 = vpop.permute.xlu1 %1401 }
 0xf92   :  { %v3299_v31 = vadd.f32 %v1402_v3, %v1386_v56 }
 0xf94   :  { %2679 = vtanh.f32 %v3299_v31 }
 0xf99   :  { %v2674_v8 = vpop.eup %2673 }
 0xf9a   :  { %1313 = vrot.lane.b32.xlu0 %v2674_v8, %s2798_s18 }
 0xf9d   :  { %v2676_v11 = vpop.eup %2675 }
 0xf9e   :  { %v2678_v58 = vpop.eup %2677  ;;  %1411 = vrot.lane.b32.xlu0 %v2676_v11, %s2798_s18 }
 0xf9f   :  { %1315 = vrot.lane.b32.xlu1 %v2678_v58, %s2798_s18 }
 0xfa1   :  { %v2680_v59 = vpop.eup %2679 }
 0xfa3   :  { %1413 = vrot.lane.b32.xlu1 %v2680_v59, %s2798_s18 }
0x100c   :  { %v1314_v13 = vpop.permute.xlu0 %1313 }
0x100d   :  { %v1319_v33 = vmul.f32 %v2666_v9, %v1314_v13 }
0x1010   :  { %v1412_v35 = vpop.permute.xlu0 %1411 }
0x1011   :  { %v1316_v0 = vpop.permute.xlu1 %1315  ;;  %v1417_v40 = vmul.f32 %v2668_v46, %v1412_v35 }
0x1012   :  { %v1320_v51 = vmul.f32 %v2670_v15, %v1316_v0 }
0x1014   :  { %v2462_v57 = vpack.i.bf16 %v1320_v51, %v1319_v33 }
0x1015   :  { %v1414_v54 = vpop.permute.xlu1 %1413 }
0x1016   :  { %v1418_v61 = vmul.f32 %v2672_v24, %v1414_v54  ;;  %2463 = vrot.lane.b32.xlu1 %v2462_v57, %s2798_s18 }
0x1018   :  { %v2457_v5 = vpack.i.bf16 %v1418_v61, %v1417_v40  ;;  %v1530_v6 = vpack.c.bf16 %v1418_v61, %v1417_v40 }
0x101a   :  { %2458 = vrot.lane.b32.xlu0 %v2457_v5, %s2799_s19 }
0x101e   :  { %1532 = vrot.lane.b32.xlu0 %v1530_v6, %s2799_s19 }
0x1088   :  { %v2464_v38 = vpop.permute.xlu1 %2463 }
0x1089   :  { %v2466_v42 = vunpack.i.h.bf16 %v2464_v38  ;;  %v2465_v25 = vunpack.i.l.bf16 %v2464_v38 }
0x108c   :  { %v2459_v7 = vpop.permute.xlu0 %2458 }
0x108d   :  { %v2461_v29 = vunpack.i.h.bf16 %v2459_v7  ;;  %v2460_v30 = vunpack.i.l.bf16 %v2459_v7 }
0x108f   :  { %v1435_v14 = vsel %vm110_vm1, %v2460_v30, %v2465_v25  ;;  %v1436_v16 = vsel %vm110_vm1, %v2461_v29, %v2466_v42 }
0x1090   :  { %v1437_v32 = vpack.c.bf16 %v1436_v16, %v1435_v14  ;;  %v1533_v17 = vpop.permute.xlu0 %1532 }
0x1091   :  { %2363 = vmatmul.mubr.msk.bf16.vlgmr.msra.gmra.mxu0 %vm110_vm1, %v1533_v17 }
0x1092   :  { %2355 = vmatmul.mubr.msk.bf16.vlgmr.msra.gmra.mxu1 %vm392_vm2, %v1437_v32  ;;  %2367 = vmatpush3.bf16.msra.mxu0 %v3229_v4 }
0x1093   :  { %2368 = vmatprep.subr.bf16.mxu0 %v2795_v1  ;;  %2379 = vmatpush3.bf16.msra.mxu1 %v3164_v12 }
0x1094   :  { %2380 = vmatprep.subr.bf16.mxu1 %v2795_v1  ;;  %2382 = vmatprep.mubr.msk.bf16.mxu1 %vm2796_vm0, %v2795_v1 }
0x1095   :  { %2374 = vmatprep.mubr.msk.bf16.mxu0 %vm2796_vm0, %v2795_v1 }
0x1096   :  { %2369 = vmatpush3.bf16.msra.mxu0 %v3242_v53 }
0x1097   :  { %2370 = vmatprep.subr.bf16.mxu0 %v2795_v1  ;;  %2381 = vmatpush3.bf16.msra.mxu1 %v3177_v41 }
0x1098   :  { %2386 = vmatprep.subr.bf16.mxu1 %v2795_v1 }
0x109a   :  { %2371 = vmatpush3.bf16.msra.mxu0 %v3251_v62 }
0x109b   :  { %2372 = vmatprep.subr.bf16.mxu0 %v2795_v1 }
0x109e   :  { %2373 = vmatpush3.bf16.msra.mxu0 %v3258_v63 }
0x109f   :  { %2398 = vmatprep.subr.bf16.mxu0 %v2795_v1 }
0x1151   :  { %v1571_v12 = vpop.f32.mrf.mxu0 }
0x1152   :  { %v1475_v19 = vpop.f32.mrf.mxu1  ;;  %v1578_v44 = vadd.f32 %v1571_v12, %v218_v18 }
0x1153   :  { %v1476_v9 = vadd.f32 %v3272_v52, %v1475_v19  ;;  %v2364_v20 = vpop.f32.mrf.mxu0 }
0x1154   :  { %v2356_v41 = vpop.f32.mrf.mxu1  ;;  %v2126_v39 = vmul.f32 -1.442695, %v1578_v44 }
0x1155   :  { %2681 = vtanh.f32 %v1476_v9  ;;  %v1574_v46 = vpop.f32.mrf.mxu0  ;;  %v2123_v48 = vmul.f32 -1.442695, %v1476_v9 }
0x1156   :  { %v1478_v15 = vpop.f32.mrf.mxu1  ;;  %2683 = vtanh.f32 %v1578_v44  ;;  %v1579_v24 = vadd.f32 %v1574_v46, %v221_v21 }
0x1157   :  { %v1479_v22 = vadd.f32 %v3272_v52, %v1478_v15  ;;  %v2365_v36 = vpop.f32.mrf.mxu0 }
0x1158   :  { %v2357_v23 = vpop.f32.mrf.mxu1  ;;  %v2127_v28 = vmul.f32 -1.442695, %v1579_v24 }
0x1159   :  { %2685 = vtanh.f32 %v1479_v22  ;;  %v2124_v27 = vmul.f32 -1.442695, %v1479_v22 }
0x115a   :  { %2687 = vtanh.f32 %v1579_v24 }
0x115b   :  { %2689 = vpow2.f32 %v2123_v48 }
0x115c   :  { %2691 = vpow2.f32 %v2126_v39 }
0x115d   :  { %2693 = vpow2.f32 %v2124_v27 }
0x115e   :  { %2695 = vpow2.f32 %v2127_v28 }
0x1162   :  { %v2682_v45 = vpop.eup %2681 }
0x1163   :  { %1500 = vrot.lane.b32.xlu1 %v2682_v45, %s2798_s18  ;;  %v2684_v2 = vpop.eup %2683 }
0x1166   :  { %v2686_v10 = vpop.eup %2685 }
0x1167   :  { %1502 = vrot.lane.b32.xlu0 %v2686_v10, %s2798_s18  ;;  %1598 = vrot.lane.b32.xlu1 %v2684_v2, %s2798_s18  ;;  %v2688_v60 = vpop.eup %2687 }
0x1168   :  { %v2690_v34 = vpop.eup %2689 }
0x1169   :  { %v2692_v37 = vpop.eup %2691  ;;  %v1488_v56 = vadd.f32 1.0, %v2690_v34 }
0x116a   :  { %v2694_v3 = vpop.eup %2693  ;;  %v1586_v8 = vadd.f32 1.0, %v2692_v37 }
0x116b   :  { %1600 = vrot.lane.b32.xlu0 %v2688_v60, %s2798_s18  ;;  %2697 = vrcp.f32 %v1488_v56  ;;  %v1489_v11 = vadd.f32 1.0, %v2694_v3  ;;  %v2696_v58 = vpop.eup %2695 }
0x116c   :  { %2699 = vrcp.f32 %v1586_v8  ;;  %v1587_v59 = vadd.f32 1.0, %v2696_v58 }
0x116d   :  { %2701 = vrcp.f32 %v1489_v11 }
0x116e   :  { %2703 = vrcp.f32 %v1587_v59 }
0x1178   :  { %v2698_v13 = vpop.eup %2697 }
0x1179   :  { %v2700_v51 = vpop.eup %2699  ;;  %v1496_v7 = vmul.f32 %v2698_v13, %v3287_v26 }
0x117a   :  { %v2702_v35 = vpop.eup %2701  ;;  %v1594_v29 = vmul.f32 %v2700_v51, %v3292_v50 }
0x117b   :  { %v2704_v5 = vpop.eup %2703  ;;  %v1497_v30 = vmul.f32 %v2702_v35, %v3294_v55 }
0x117c   :  { %v1595_v12 = vmul.f32 %v2704_v5, %v3299_v31 }
0x11d5   :  { %v1501_v0 = vpop.permute.xlu1 %1500 }
0x11d6   :  { %v1506_v33 = vmul.f32 %v2698_v13, %v1501_v0 }
0x11d8   :  { %1510 = vrot.lane.b32.xlu1 %v1506_v33, %s2799_s19 }
0x11d9   :  { %v1503_v57 = vpop.permute.xlu0 %1502  ;;  %v1599_v54 = vpop.permute.xlu1 %1598 }
0x11da   :  { %v1507_v40 = vmul.f32 %v2702_v35, %v1503_v57  ;;  %v1604_v61 = vmul.f32 %v2700_v51, %v1599_v54 }
0x11dc   :  { %1608 = vrot.lane.b32.xlu1 %v1604_v61, %s2799_s19  ;;  %1512 = vrot.lane.b32.xlu0 %v1507_v40, %s2799_s19 }
0x11dd   :  { %v1601_v6 = vpop.permute.xlu0 %1600 }
0x11de   :  { %v1605_v38 = vmul.f32 %v2704_v5, %v1601_v6 }
0x11e0   :  { %1610 = vrot.lane.b32.xlu0 %v1605_v38, %s2799_s19 }
0x124a   :  { %v1511_v42 = vpop.permute.xlu1 %1510 }
0x124b   :  { %v3344_v25 = vadd.f32 %v1511_v42, %v1496_v7 }
0x124d   :  { %2705 = vtanh.f32 %v3344_v25 }
0x124e   :  { %v1609_v14 = vpop.permute.xlu1 %1608  ;;  %v1513_v16 = vpop.permute.xlu0 %1512 }
0x124f   :  { %v3349_v32 = vadd.f32 %v1609_v14, %v1594_v29  ;;  %v3351_v17 = vadd.f32 %v1513_v16, %v1497_v30 }
0x1251   :  { %2707 = vtanh.f32 %v3349_v32 }
0x1252   :  { %2709 = vtanh.f32 %v3351_v17  ;;  %v1611_v26 = vpop.permute.xlu0 %1610 }
0x1253   :  { %v3356_v18 = vadd.f32 %v1611_v26, %v1595_v12 }
0x1255   :  { %2711 = vtanh.f32 %v3356_v18 }
0x125a   :  { %v2706_v50 = vpop.eup %2705 }
0x125b   :  { %1522 = vrot.lane.b32.xlu1 %v2706_v50, %s2798_s18 }
0x125e   :  { %v2708_v55 = vpop.eup %2707 }
0x125f   :  { %v2710_v19 = vpop.eup %2709  ;;  %1620 = vrot.lane.b32.xlu1 %v2708_v55, %s2798_s18 }
0x1260   :  { %1524 = vrot.lane.b32.xlu0 %v2710_v19, %s2798_s18 }
0x1262   :  { %v2712_v9 = vpop.eup %2711 }
0x1264   :  { %1622 = vrot.lane.b32.xlu0 %v2712_v9, %s2798_s18 }
0x12cd   :  { %v1523_v31 = vpop.permute.xlu1 %1522 }
0x12ce   :  { %v1528_v44 = vmul.f32 %v2698_v13, %v1523_v31 }
0x12d1   :  { %v1621_v46 = vpop.permute.xlu1 %1620 }
0x12d2   :  { %v1525_v20 = vpop.permute.xlu0 %1524  ;;  %v1626_v22 = vmul.f32 %v2700_v51, %v1621_v46 }
0x12d3   :  { %v1529_v41 = vmul.f32 %v2702_v35, %v1525_v20 }
0x12d5   :  { %v2472_v15 = vpack.i.bf16 %v1529_v41, %v1528_v44 }
0x12d6   :  { %v1623_v21 = vpop.permute.xlu0 %1622 }
0x12d7   :  { %v1627_v36 = vmul.f32 %v2704_v5, %v1623_v21  ;;  %2473 = vrot.lane.b32.xlu0 %v2472_v15, %s2798_s18 }
0x12d9   :  { %v2467_v23 = vpack.i.bf16 %v1627_v36, %v1626_v22  ;;  %v1739_v24 = vpack.c.bf16 %v1627_v36, %v1626_v22 }
0x12db   :  { %2468 = vrot.lane.b32.xlu1 %v2467_v23, %s2799_s19 }
0x12df   :  { %1741 = vrot.lane.b32.xlu1 %v1739_v24, %s2799_s19 }
0x1349   :  { %v2474_v45 = vpop.permute.xlu0 %2473 }
0x134a   :  { %v2476_v10 = vunpack.i.h.bf16 %v2474_v45  ;;  %v2475_v60 = vunpack.i.l.bf16 %v2474_v45 }
0x134d   :  { %v2469_v2 = vpop.permute.xlu1 %2468 }
0x134e   :  { %v2471_v48 = vunpack.i.h.bf16 %v2469_v2  ;;  %v2470_v39 = vunpack.i.l.bf16 %v2469_v2 }
0x1350   :  { %v1644_v27 = vsel %vm110_vm1, %v2470_v39, %v2475_v60  ;;  %v1645_v28 = vsel %vm110_vm1, %v2471_v48, %v2476_v10 }
0x1351   :  { %v1646_v34 = vpack.c.bf16 %v1645_v28, %v1644_v27  ;;  %v1742_v37 = vpop.permute.xlu1 %1741 }
0x1352   :  { %2383 = vmatmul.mubr.msk.bf16.vlgmr.msra.gmra.mxu1 %vm110_vm1, %v1742_v37 }
0x1353   :  { %2375 = vmatmul.mubr.msk.bf16.vlgmr.msra.gmra.mxu0 %vm392_vm2, %v1646_v34  ;;  %2387 = vmatpush3.bf16.msra.mxu1 %v3229_v4  ;;  %v226_v4 = vadd.f32 %v3265_v49, %v3055_v43 }
0x1354   :  { %2388 = vmatprep.subr.bf16.mxu1 %v2795_v1  ;;  %2394 = vmatprep.mubr.msk.bf16.mxu1 %vm2796_vm0, %v2795_v1 }
0x1355   :  { %2402 = vmatprep.mubr.msk.bf16.mxu0 %vm2796_vm0, %v2795_v1 }
0x1357   :  { %2389 = vmatpush3.bf16.msra.mxu1 %v3242_v53 }
0x1358   :  { %2390 = vmatprep.subr.bf16.mxu1 %v2795_v1 }
0x135b   :  { %2391 = vmatpush3.bf16.msra.mxu1 %v3251_v62  ;;  %v229_v62 = vadd.f32 %v3265_v49, %v3059_v47 }
0x135c   :  { %2392 = vmatprep.subr.bf16.mxu1 %v2795_v1 }
0x135f   :  { %2393 = vmatpush3.bf16.msra.mxu1 %v3258_v63 }
0x1412   :  { %v1780_v56 = vpop.f32.mrf.mxu1 }
0x1413   :  { %v1684_v3 = vpop.f32.mrf.mxu0  ;;  %v1787_v58 = vadd.f32 %v1780_v56, %v226_v4 }
0x1414   :  { %v1685_v8 = vadd.f32 %v3272_v52, %v1684_v3  ;;  %v2384_v11 = vpop.f32.mrf.mxu1 }
0x1415   :  { %v2376_v59 = vpop.f32.mrf.mxu0  ;;  %v2132_v49 = vmul.f32 -1.442695, %v1787_v58 }
0x1416   :  { %2713 = vtanh.f32 %v1685_v8  ;;  %v1783_v53 = vpop.f32.mrf.mxu1  ;;  %v2129_v47 = vmul.f32 -1.442695, %v1685_v8 }
0x1417   :  { %v1687_v13 = vpop.f32.mrf.mxu0  ;;  %2715 = vtanh.f32 %v1787_v58  ;;  %v1788_v51 = vadd.f32 %v1783_v53, %v229_v62 }
0x1418   :  { %v1688_v0 = vadd.f32 %v3272_v52, %v1687_v13  ;;  %v2385_v33 = vpop.f32.mrf.mxu1 }
0x1419   :  { %v2377_v63 = vpop.f32.mrf.mxu0  ;;  %v2133_v61 = vmul.f32 -1.442695, %v1788_v51 }
0x141a   :  { %2717 = vtanh.f32 %v1688_v0  ;;  %v2130_v40 = vmul.f32 -1.442695, %v1688_v0 }
0x141b   :  { %2719 = vtanh.f32 %v1788_v51 }
0x141c   :  { %2721 = vpow2.f32 %v2129_v47 }
0x141d   :  { %2723 = vpow2.f32 %v2132_v49 }
0x141e   :  { %2725 = vpow2.f32 %v2130_v40 }
0x141f   :  { %2727 = vpow2.f32 %v2133_v61 }
0x1423   :  { %v2714_v43 = vpop.eup %2713 }
0x1424   :  { %1709 = vrot.lane.b32.xlu0 %v2714_v43, %s2798_s18  ;;  %v2716_v35 = vpop.eup %2715 }
0x1427   :  { %v2718_v57 = vpop.eup %2717 }
0x1428   :  { %1807 = vrot.lane.b32.xlu0 %v2716_v35, %s2798_s18  ;;  %1711 = vrot.lane.b32.xlu1 %v2718_v57, %s2798_s18  ;;  %v2720_v54 = vpop.eup %2719 }
0x1429   :  { %v2722_v5 = vpop.eup %2721 }
0x142a   :  { %v2724_v6 = vpop.eup %2723  ;;  %v1697_v38 = vadd.f32 1.0, %v2722_v5 }
0x142b   :  { %v2726_v7 = vpop.eup %2725  ;;  %v1795_v42 = vadd.f32 1.0, %v2724_v6 }
0x142c   :  { %1809 = vrot.lane.b32.xlu1 %v2720_v54, %s2798_s18  ;;  %2729 = vrcp.f32 %v1697_v38  ;;  %v1698_v29 = vadd.f32 1.0, %v2726_v7  ;;  %v2728_v30 = vpop.eup %2727 }
0x142d   :  { %2731 = vrcp.f32 %v1795_v42  ;;  %v1796_v14 = vadd.f32 1.0, %v2728_v30 }
0x142e   :  { %2733 = vrcp.f32 %v1698_v29 }
0x142f   :  { %2735 = vrcp.f32 %v1796_v14 }
0x1439   :  { %v2730_v16 = vpop.eup %2729 }
0x143a   :  { %v2732_v50 = vpop.eup %2731  ;;  %v1705_v15 = vmul.f32 %v2730_v16, %v3344_v25 }
0x143b   :  { %v2734_v55 = vpop.eup %2733  ;;  %v1803_v36 = vmul.f32 %v2732_v50, %v3349_v32 }
0x143c   :  { %v2736_v44 = vpop.eup %2735  ;;  %v1706_v23 = vmul.f32 %v2734_v55, %v3351_v17 }
0x143d   :  { %v1804_v60 = vmul.f32 %v2736_v44, %v3356_v18 }
0x1496   :  { %v1710_v12 = vpop.permute.xlu0 %1709 }
0x1497   :  { %v1715_v26 = vmul.f32 %v2730_v16, %v1710_v12 }
0x1499   :  { %1719 = vrot.lane.b32.xlu0 %v1715_v26, %s2799_s19 }
0x149a   :  { %v1808_v19 = vpop.permute.xlu0 %1807  ;;  %v1712_v9 = vpop.permute.xlu1 %1711 }
0x149b   :  { %v1813_v31 = vmul.f32 %v2732_v50, %v1808_v19  ;;  %v1716_v20 = vmul.f32 %v2734_v55, %v1712_v9 }
0x149d   :  { %1817 = vrot.lane.b32.xlu0 %v1813_v31, %s2799_s19  ;;  %1721 = vrot.lane.b32.xlu1 %v1716_v20, %s2799_s19 }
0x149e   :  { %v1810_v41 = vpop.permute.xlu1 %1809 }
0x149f   :  { %v1814_v46 = vmul.f32 %v2736_v44, %v1810_v41  ;;  %v2503_v41 = vld [vmem:[%s3449_s6 + $0x8] sm:$0xff]  }
0x14a0   :  { %2399 = vmatpush3.bf16.msra.mxu0 %v2503_v41 }
0x14a1   :  { %1819 = vrot.lane.b32.xlu1 %v1814_v46, %s2799_s19  ;;  %v2504_v46 = vld [vmem:[%s3449_s6] sm:$0xff]   ;;  %2400 = vmatprep.subr.bf16.mxu0 %v2795_v1 }
0x14a2   :  { %v2137_v1 = vld [vmem:[%s3450_s7] ss:$0 sm:$0xff]  ;;  %s2800_s7 = smov [#allocation2]  }
0x14a4   :  { %2401 = vmatpush3.bf16.msra.mxu0 %v2504_v46 }
0x150b   :  { %v1720_v21 = vpop.permute.xlu0 %1719 }
0x150c   :  { %v3396_v22 = vadd.f32 %v1720_v21, %v1705_v15 }
0x150e   :  { %2737 = vtanh.f32 %v3396_v22 }
0x150f   :  { %v1818_v24 = vpop.permute.xlu0 %1817  ;;  %v1722_v45 = vpop.permute.xlu1 %1721 }
0x1510   :  { %v1823_v2 = vadd.f32 %v1818_v24, %v1803_v36  ;;  %v3401_v10 = vadd.f32 %v1722_v45, %v1706_v23 }
0x1512   :  { %2739 = vtanh.f32 %v1823_v2 }
0x1513   :  { %2741 = vtanh.f32 %v3401_v10  ;;  %v1820_v25 = vpop.permute.xlu1 %1819 }
0x1514   :  { %v1824_v48 = vadd.f32 %v1820_v25, %v1804_v60 }
0x1516   :  { %2743 = vtanh.f32 %v1824_v48 }
0x151b   :  { %v2738_v39 = vpop.eup %2737 }
0x151c   :  { %1731 = vrot.lane.b32.xlu0 %v2738_v39, %s2798_s18 }
0x151f   :  { %v2740_v27 = vpop.eup %2739 }
0x1520   :  { %v2742_v32 = vpop.eup %2741  ;;  %1829 = vrot.lane.b32.xlu0 %v2740_v27, %s2798_s18 }
0x1521   :  { %1733 = vrot.lane.b32.xlu1 %v2742_v32, %s2798_s18 }
0x1523   :  { %v2744_v17 = vpop.eup %2743 }
0x1525   :  { %1831 = vrot.lane.b32.xlu1 %v2744_v17, %s2798_s18 }
0x158e   :  { %v1732_v28 = vpop.permute.xlu0 %1731 }
0x158f   :  { %v1737_v18 = vmul.f32 %v2730_v16, %v1732_v28 }
0x1592   :  { %v1830_v56 = vpop.permute.xlu0 %1829 }
0x1593   :  { %v1734_v34 = vpop.permute.xlu1 %1733  ;;  %v1835_v8 = vmul.f32 %v2732_v50, %v1830_v56 }
0x1594   :  { %v1738_v37 = vmul.f32 %v2734_v55, %v1734_v34 }
0x1596   :  { %v2482_v4 = vpack.i.bf16 %v1738_v37, %v1737_v18  ;;  %v2027_v37 = vlaneseq }
0x1597   :  { %v1832_v3 = vpop.permute.xlu1 %1831 }
0x1598   :  { %v1836_v11 = vmul.f32 %v2736_v44, %v1832_v3  ;;  %2483 = vrot.lane.b32.xlu1 %v2482_v4, %s2798_s18  ;;  %v2028_v4 = vshrl.u32 %v2027_v37, 7 }
0x159a   :  { %v2477_v58 = vpack.i.bf16 %v1836_v11, %v1835_v8  ;;  %v2029_v3 = vadd.s32 8, %v2028_v4 }
0x159c   :  { %2478 = vrot.lane.b32.xlu0 %v2477_v58, %s2799_s19  ;;  %vm2031_vm3 = vcmp.lt.s32.totalorder %v2029_v3, 9 }
0x160a   :  { %v2484_v59 = vpop.permute.xlu1 %2483 }
0x160b   :  { %v2486_v13 = vunpack.i.h.bf16 %v2484_v59  ;;  %v2485_v62 = vunpack.i.l.bf16 %v2484_v59 }
0x160e   :  { %v2479_v53 = vpop.permute.xlu0 %2478 }
0x160f   :  { %v2481_v0 = vunpack.i.h.bf16 %v2479_v53  ;;  %v2480_v33 = vunpack.i.l.bf16 %v2479_v53 }
0x1611   :  { %v1853_v63 = vsel %vm110_vm1, %v2480_v33, %v2485_v62  ;;  %v1854_v51 = vsel %vm110_vm1, %v2481_v0, %v2486_v13 }
0x1612   :  { %v1855_v43 = vpack.c.bf16 %v1854_v51, %v1853_v63 }
0x1614   :  { %2395 = vmatmul.mubr.msk.bf16.vlgmr.msra.gmra.mxu1 %vm392_vm2, %v1855_v43 }
0x16d4   :  { %v1893_v35 = vpop.f32.mrf.mxu1 }
0x16d5   :  { %v1894_v57 = vadd.f32 %v3272_v52, %v1893_v35 }
0x16d6   :  { %v2396_v54 = vpop.f32.mrf.mxu1 }
0x16d7   :  { %2745 = vtanh.f32 %v1894_v57  ;;  %v2135_v6 = vmul.f32 -1.442695, %v1894_v57 }
0x16d8   :  { %v1896_v47 = vpop.f32.mrf.mxu1 }
0x16d9   :  { %v1897_v49 = vadd.f32 %v3272_v52, %v1896_v47 }
0x16da   :  { %v2397_v40 = vpop.f32.mrf.mxu1 }
0x16db   :  { %2747 = vtanh.f32 %v1897_v49  ;;  %v2136_v38 = vmul.f32 -1.442695, %v1897_v49 }
0x16dc   :  { %2749 = vpow2.f32 %v2135_v6 }
0x16dd   :  { %2751 = vpow2.f32 %v2136_v38 }
0x16e4   :  { %v2746_v61 = vpop.eup %2745 }
0x16e5   :  { %1918 = vrot.lane.b32.xlu0 %v2746_v61, %s2798_s18 }
0x16e8   :  { %v2748_v5 = vpop.eup %2747 }
0x16e9   :  { %1920 = vrot.lane.b32.xlu1 %v2748_v5, %s2798_s18  ;;  %v2750_v7 = vpop.eup %2749 }
0x16ea   :  { %v1906_v42 = vadd.f32 1.0, %v2750_v7  ;;  %v2752_v29 = vpop.eup %2751 }
0x16eb   :  { %v1907_v30 = vadd.f32 1.0, %v2752_v29 }
0x16ec   :  { %2753 = vrcp.f32 %v1906_v42 }
0x16ed   :  { %2755 = vrcp.f32 %v1907_v30 }
0x16f9   :  { %v2754_v14 = vpop.eup %2753 }
0x16fa   :  { %v2756_v12 = vpop.eup %2755  ;;  %v1914_v55 = vmul.f32 %v2754_v14, %v3396_v22 }
0x16fb   :  { %v1915_v31 = vmul.f32 %v2756_v12, %v3401_v10 }
0x1757   :  { %v1919_v52 = vpop.permute.xlu0 %1918 }
0x1758   :  { %v1924_v16 = vmul.f32 %v2754_v14, %v1919_v52 }
0x175a   :  { %1928 = vrot.lane.b32.xlu0 %v1924_v16, %s2799_s19 }
0x175b   :  { %v1921_v26 = vpop.permute.xlu1 %1920 }
0x175c   :  { %v1925_v50 = vmul.f32 %v2756_v12, %v1921_v26 }
0x175e   :  { %1930 = vrot.lane.b32.xlu1 %v1925_v50, %s2799_s19 }
0x17cc   :  { %v1929_v19 = vpop.permute.xlu0 %1928 }
0x17cd   :  { %v1934_v9 = vadd.f32 %v1929_v19, %v1914_v55 }
0x17cf   :  { %2757 = vtanh.f32 %v1934_v9 }
0x17d0   :  { %v1931_v20 = vpop.permute.xlu1 %1930 }
0x17d1   :  { %v1935_v44 = vadd.f32 %v1931_v20, %v1915_v31 }
0x17d3   :  { %2759 = vtanh.f32 %v1935_v44 }
0x17dc   :  { %v2758_v15 = vpop.eup %2757 }
0x17dd   :  { %1940 = vrot.lane.b32.xlu0 %v2758_v15, %s2798_s18 }
0x17e0   :  { %v2760_v21 = vpop.eup %2759 }
0x17e1   :  { %1942 = vrot.lane.b32.xlu1 %v2760_v21, %s2798_s18  ;;  %s2056_s18 = sshll.u32 %s2800_s7, 4  ;;  %s2057_s18 = int_to_ptr.vmem [resolvable:$true] %s2056_s18 }
0x17e2   :  { %s2777_s1 = scalar_lea.vmem %s2057_s18, 32  ;;  %p2778_p1 = scmp.lt.s32.totalorder %s2057_s18, %s2057_s18 }
0x184f   :  { %v1941_v22 = vpop.permute.xlu0 %1940 }
0x1850   :  { %v1946_v23 = vmul.f32 %v2754_v14, %v1941_v22 }
0x1853   :  { %v1943_v36 = vpop.permute.xlu1 %1942 }
0x1854   :  { %v1947_v24 = vmul.f32 %v2756_v12, %v1943_v36 }
0x1856   :  { %v1948_v45 = vpack.c.bf16 %v1947_v24, %v1946_v23 }
0x1858   :  { %1961 = vrot.lane.b32.xlu0 %v1948_v45, %s2799_s19  ;;  %s2773_s19 = scalar_lea.vmem %s2057_s18, 16 }
0x1859   :  { %p2774_p0 = scmp.ne.s32.totalorder %s2057_s18, %s2773_s19  ;;  %p2779_p2 = scmp.lt.s32.totalorder %s2777_s1, %s2773_s19 }
0x185b   :  { %p2780_p3 = por %p2779_p2, %p2778_p1 }
0x185d   :  { %p2781_p4 = pnand %p2780_p3, %p2774_p0 }
0x18ca   :  { %v1962_v2 = vpop.permute.xlu0 %1961 }
0x18cb   :  { %2403 = vmatmul.mubr.msk.bf16.vlgmr.msra.gmra.mxu0 %vm110_vm1, %v1962_v2 }
0x198b   :  { %v2012_v10 = vpop.f32.mrf.mxu0 }
0x198c   :  { %v2013_v60 = vadd.f32 %v2137_v1, %v2012_v10 }
0x198d   :  { %v2404_v25 = vpop.f32.mrf.mxu0 }
0x198e   :  { %v2019_v48 = vmul.f32 %v2013_v60, %v2013_v60 }
0x198f   :  { %v2015_v39 = vpop.f32.mrf.mxu0 }
0x1990   :  { %v2016_v27 = vadd.f32 %v2137_v1, %v2015_v39  ;;  %v2021_v32 = vsel %vm110_vm1, %v2019_v48, 0.0 }
0x1991   :  { %2022 = vadd.xlane.f32.xlu0 %v2021_v32  ;;  %v2405_v17 = vpop.f32.mrf.mxu0 }
0x1992   :  { %v2020_v28 = vmul.f32 %v2016_v27, %v2016_v27 }
0x1994   :  { %v2024_v34 = vsel %vm110_vm1, %v2020_v28, 0.0 }
0x1995   :  { %2025 = vadd.xlane.f32.xlu1 %v2024_v34 }
0x1a1a   :  { %v2023_v18 = vpop.xlane.xlu0 %2022 }
0x1a1b   :  { %2761 = vrsqrt.f32 %v2023_v18 }
0x1a1e   :  { %v2026_v56 = vpop.xlane.xlu1 %2025 }
0x1a1f   :  { %2763 = vrsqrt.f32 %v2026_v56 }
0x1a28   :  { %v2762_v8 = vpop.eup %2761 }
0x1a29   :  { %v2036_v58 = vmul.f32 %v2762_v8, %v2013_v60 }
0x1a2b   :  { %v2038_v13 = vsel %vm110_vm1, %v2036_v58, 0.0 }
0x1a2c   :  { %v2764_v11 = vpop.eup %2763 }
0x1a2d   :  { %v2035_v59 = vsel %vm2031_vm3, %v2764_v11, 0.0 }
0x1a2e   :  { %v2037_v53 = vmul.f32 %v2035_v59, %v2016_v27 }
0x1a30   :  { %v2039_v62 = vsel %vm110_vm1, %v2037_v53, 0.0 }
0x1a31   :  { %v2040_v0 = vadd.f32 %v2039_v62, %v2038_v13 }
0x1a33   :  { %v2041_v33 = vrot.slane %v2040_v0, 4 }
0x1a35   :  { %v2042_v63 = vadd.f32 %v2041_v33, %v2040_v0 }
0x1a37   :  { %v2043_v51 = vrot.slane %v2042_v63, 2 }
0x1a39   :  { %v2044_v43 = vadd.f32 %v2043_v51, %v2042_v63 }
0x1a3b   :  { %v2045_v35 = vrot.slane %v2044_v43, 1 }
0x1a3d   :  { %v2046_v57 = vadd.f32 %v2045_v35, %v2044_v43 }
0x1a3f   :  { %v2047_v54 = vmul.f32 0.11111111, %v2046_v57 }
0x1a41   :  { %2049 = vst.msk [vmem:[#allocation2] sm:$0x1] %vm2048_vm4, %v2047_v54 }
0x1a42   :  { %2784 = shalt.err (!%p2781_p4)
}
0x1a43   :  { %2059 = dma.vmem_to_hbm [thread:$0]  %s2057_s18, 16, %s3451_s8, [#allocation3]  }
0x1a44   :  { %2793 = dma.done.wait [#allocation3], 16  }
0x1a45   :  { %2794 = vsyncadd [#allocation3], 4294967280 }
0x1a46   :  { %2063 = vsyncpa [#allocation3], 1 }

</bundles_post_ra>
